<compile_context>
chip_gen: v6e
topology: v6e:2x2x1
jax: 0.10.0
libtpu: 0.0.40
codegen_flags: <defaults>
</compile_context>

<pallas_src>
import functools

import jax
import jax.numpy as jnp
import numpy as np
from jax.experimental import pallas as pl
from jax.experimental.pallas import tpu as pltpu


# ----------------------------- in-kernel helpers -----------------------------

def _layernorm(x, gamma, beta, eps):
    mean = jnp.mean(x, axis=-1, keepdims=True)
    var = jnp.mean(jnp.square(x - mean), axis=-1, keepdims=True)
    return (x - mean) * jax.lax.rsqrt(var + eps) * gamma + beta


# --------------------------------- kernel ------------------------------------

def bert_layer_kernel(
    xq_ref, xkv_ref, mask_ref,
    wq_ref, bq_ref, wk_ref, bk_ref, wv_ref, bv_ref,
    wao_ref, bao_ref, g1_ref, beta1_ref,
    wi_ref, bi_ref, wo_ref, bo_ref, g2_ref, beta2_ref,
    out_ref,
    k_scr, v_scr,
    *, num_heads, head_dim, eps,
):
    q_idx = pl.program_id(1)

    # K/V for the full sequence: computed once per batch row (first query tile) and kept
    # in VMEM scratch (bf16) for all subsequent query tiles of that row.
    @pl.when(q_idx == 0)
    def _():
        x_kv = xkv_ref[0].astype(jnp.bfloat16)                       # (S, H)
        for h in range(num_heads):
            kh = jnp.dot(x_kv, wk_ref[h],
                         preferred_element_type=jnp.float32) + bk_ref[h]
            vh = jnp.dot(x_kv, wv_ref[h],
                         preferred_element_type=jnp.float32) + bv_ref[h]
            k_scr[h] = kh.astype(k_scr.dtype)
            v_scr[h] = vh.astype(v_scr.dtype)

    x_res = xq_ref[0].astype(jnp.float32)                            # (TQ, H) residual
    x_q = x_res.astype(jnp.bfloat16)
    mask = mask_ref[0].astype(jnp.float32)                           # (1, S) additive
    scale = 1.0 / float(np.sqrt(head_dim))

    # ---- self attention: per-head loop with W_attn_out folded in (no concat) ----
    attn_proj = jnp.zeros_like(x_res)                                # (TQ, H) f32 acc
    for h in range(num_heads):
        qh = (jnp.dot(x_q, wq_ref[h], preferred_element_type=jnp.float32)
              + bq_ref[h]) * scale                                   # (TQ, dh) f32
        # scores = q @ k^T  (contract dh of both operands, no in-kernel transpose)
        scores = jax.lax.dot_general(
            qh.astype(jnp.bfloat16), k_scr[h],
            (((1,), (1,)), ((), ())),
            preferred_element_type=jnp.float32) + mask               # (TQ, S)
        scores = scores - jnp.max(scores, axis=-1, keepdims=True)
        p = jnp.exp(scores)
        p = p * pl.reciprocal(jnp.sum(p, axis=-1, keepdims=True), approx=True)
        ctx = jnp.dot(p.astype(jnp.bfloat16), v_scr[h],
                      preferred_element_type=jnp.float32)            # (TQ, dh)
        attn_proj = attn_proj + jnp.dot(ctx.astype(jnp.bfloat16), wao_ref[h],
                                        preferred_element_type=jnp.float32)

    attn_proj = attn_proj + bao_ref[0]
    # dense -> (dropout = identity) -> residual -> LayerNorm  (f32 statistics)
    attn_out = _layernorm(attn_proj + x_res, g1_ref[0], beta1_ref[0], eps)

    # ---- feed forward: intermediate dense + exact GELU ----
    inter = jnp.dot(attn_out.astype(jnp.bfloat16), wi_ref[...],
                    preferred_element_type=jnp.float32) + bi_ref[0]
    inter = 0.5 * inter * (1.0 + jax.lax.erf(inter * 0.7071067811865476))

    # ---- feed forward output: dense + residual + LayerNorm ----
    ff = jnp.dot(inter.astype(jnp.bfloat16), wo_ref[...],
                 preferred_element_type=jnp.float32) + bo_ref[0]
    out = _layernorm(ff + attn_out, g2_ref[0], beta2_ref[0], eps)
    out_ref[0] = out.astype(out_ref.dtype)


# --------------------------------- wrapper -----------------------------------

def my_bert_layer(x, attention_mask, params, *, num_heads, layer_norm_eps=1e-12,
                  block_q=None, compute_dtype=jnp.bfloat16):
    B, S, H = x.shape
    I = params["wi"].shape[0]
    dh = H // num_heads

    # Query-tile size: multiple of 8 (sublane) dividing S, else the full sequence.
    tq = block_q if block_q is not None else min(S, 256)
    if S % tq != 0 or (tq != S and tq % 8 != 0):
        tq = S
    nq = S // tq

    # ---- host-side weight relayout (one-time; removes every in-kernel transpose) ----
    def head_w(w):   # PyTorch (out, in) -> per-head (NH, in, dh) so x @ w gives (TQ, dh)
        return (jnp.transpose(w).reshape(H, num_heads, dh)
                .transpose(1, 0, 2).astype(compute_dtype))

    def head_b(b):   # (1, H) -> (NH, 1, dh), kept f32 (added after f32 accumulation)
        return b.astype(jnp.float32).reshape(num_heads, 1, dh)

    wq_h, bq_h = head_w(params["wq"]), head_b(params["bq"])
    wk_h, bk_h = head_w(params["wk"]), head_b(params["bk"])
    wv_h, bv_h = head_w(params["wv"]), head_b(params["bv"])
    wao_h = jnp.transpose(params["wao"]).reshape(num_heads, dh, H).astype(compute_dtype)
    wi_t = jnp.transpose(params["wi"]).astype(compute_dtype)   # (H, I)
    wo_t = jnp.transpose(params["wo"]).astype(compute_dtype)   # (I, H)
    bao = params["bao"].astype(jnp.float32)
    bi = params["bi"].astype(jnp.float32)
    bo = params["bo"].astype(jnp.float32)
    g1, beta1 = params["g1"].astype(jnp.float32), params["beta1"].astype(jnp.float32)
    g2, beta2 = params["g2"].astype(jnp.float32), params["beta2"].astype(jnp.float32)

    def full_spec(shape):
        zeros = (0,) * len(shape)
        return pl.BlockSpec(shape, lambda b, q, _z=zeros: _z)

    in_specs = [
        pl.BlockSpec((1, tq, H), lambda b, q: (b, q, 0)),   # x: query tile / residual
        pl.BlockSpec((1, S, H), lambda b, q: (b, 0, 0)),    # x: full row for K/V
        pl.BlockSpec((1, 1, S), lambda b, q: (b, 0, 0)),    # additive attention mask
        full_spec((num_heads, H, dh)), full_spec((num_heads, 1, dh)),   # Wq, bq
        full_spec((num_heads, H, dh)), full_spec((num_heads, 1, dh)),   # Wk, bk
        full_spec((num_heads, H, dh)), full_spec((num_heads, 1, dh)),   # Wv, bv
        full_spec((num_heads, dh, H)), full_spec((1, H)),               # Wao, bao
        full_spec((1, H)), full_spec((1, H)),                           # LN1 gamma, beta
        full_spec((H, I)), full_spec((1, I)),                           # Wi, bi
        full_spec((I, H)), full_spec((1, H)),                           # Wo, bo
        full_spec((1, H)), full_spec((1, H)),                           # LN2 gamma, beta
    ]

    operands = (x, x, attention_mask,
                wq_h, bq_h, wk_h, bk_h, wv_h, bv_h,
                wao_h, bao, g1, beta1,
                wi_t, bi, wo_t, bo, g2, beta2)

    # Explicit VMEM budget from the real working set (double-buffered weights and
    # activation blocks, lane-padded K/V scratch) plus headroom; clamp to sane bounds.
    def nbytes(a):
        return int(np.prod(a.shape)) * a.dtype.itemsize
    weight_bytes = sum(nbytes(a) for a in operands[3:])
    act_bytes = (tq * H + S * H + S) * x.dtype.itemsize
    scr_bytes = 2 * num_heads * S * max(dh, 128) * 2
    out_bytes = tq * H * x.dtype.itemsize
    vmem_limit = int(2.5 * (2 * weight_bytes + 2 * act_bytes + scr_bytes + 2 * out_bytes))
    vmem_limit = max(16 * 2**20, min(vmem_limit, 64 * 2**20))

    kernel = functools.partial(bert_layer_kernel, num_heads=num_heads, head_dim=dh,
                               eps=layer_norm_eps)

    return pl.pallas_call(
        kernel,
        out_shape=jax.ShapeDtypeStruct((B, S, H), x.dtype),
        grid=(B, nq),
        in_specs=in_specs,
        out_specs=pl.BlockSpec((1, tq, H), lambda b, q: (b, q, 0)),
        scratch_shapes=[
            pltpu.VMEM((num_heads, S, dh), compute_dtype),   # K cache (per head)
            pltpu.VMEM((num_heads, S, dh), compute_dtype),   # V cache (per head)
        ],
        compiler_params=pltpu.CompilerParams(
            dimension_semantics=("parallel", "arbitrary"),
            vmem_limit_bytes=vmem_limit,
        ),
    )(*operands)


# ------------------------------ pure-JAX reference ----------------------------

def reference(x, mask, p, num_heads, eps=1e-12):
    B, S, H = x.shape
    dh = H // num_heads

    def lin(a, w, b):
        return a @ w.T + b[0]

    def ln(a, g, b):
        m = a.mean(-1, keepdims=True)
        v = ((a - m) ** 2).mean(-1, keepdims=True)
        return (a - m) / jnp.sqrt(v + eps) * g[0] + b[0]

    q = lin(x, p["wq"], p["bq"]).reshape(B, S, num_heads, dh).transpose(0, 2, 1, 3)
    k = lin(x, p["wk"], p["bk"]).reshape(B, S, num_heads, dh).transpose(0, 2, 1, 3)
    v = lin(x, p["wv"], p["bv"]).reshape(B, S, num_heads, dh).transpose(0, 2, 1, 3)
    s = jnp.einsum("bhqd,bhkd->bhqk", q, k) / np.sqrt(dh) + mask[:, None, :, :]
    pr = jax.nn.softmax(s, axis=-1)
    ctx = jnp.einsum("bhqk,bhkd->bhqd", pr, v).transpose(0, 2, 1, 3).reshape(B, S, H)
    a = ln(lin(ctx, p["wao"], p["bao"]) + x, p["g1"], p["beta1"])
    inter = jax.nn.gelu(lin(a, p["wi"], p["bi"]), approximate=False)
    return ln(lin(inter, p["wo"], p["bo"]) + a, p["g2"], p["beta2"])


# ----------------------------------- main -------------------------------------

if __name__ == "__main__":
    B, S, H, NH, I = 2, 8, 32, 4, 64  # batch, seq, hidden, heads, intermediate
    key = jax.random.PRNGKey(0)
    keys = jax.random.split(key, 20)

    def w(k, shape):
        return (0.02 * jax.random.normal(k, shape)).astype(jnp.float32)

    params = {
        "wq": w(keys[0], (H, H)),  "bq": w(keys[1], (1, H)),
        "wk": w(keys[2], (H, H)),  "bk": w(keys[3], (1, H)),
        "wv": w(keys[4], (H, H)),  "bv": w(keys[5], (1, H)),
        "wao": w(keys[6], (H, H)), "bao": w(keys[7], (1, H)),
        "g1": jnp.ones((1, H), jnp.float32), "beta1": jnp.zeros((1, H), jnp.float32),
        "wi": w(keys[8], (I, H)),  "bi": w(keys[9], (1, I)),
        "wo": w(keys[10], (H, I)), "bo": w(keys[11], (1, H)),
        "g2": jnp.ones((1, H), jnp.float32), "beta2": jnp.zeros((1, H), jnp.float32),
    }

    x = jax.random.normal(keys[12], (B, S, H), dtype=jnp.float32)
    # HF-style additive mask: 0 for attended positions, -10000 for masked ones.
    mask = jnp.zeros((B, 1, S), dtype=jnp.float32)
    mask = mask.at[:, :, -2:].set(-10000.0)  # mask the last two key positions

    out = my_bert_layer(x, mask, params, num_heads=NH)
    out = jax.block_until_ready(out)

    ref = reference(x, mask, params, NH)
    # bf16 matmul operands + approx reciprocal -> loosened tolerance (LN stats are f32).
    np.testing.assert_allclose(np.asarray(out), np.asarray(ref), rtol=2e-2, atol=2e-2)

    print("KERNEL_OK")
</pallas_src>

<mosaic_0001>
module attributes {stable_mosaic.version = 11 : i64} {
  func.func @bert_layer_kernel(%arg0: i32, %arg1: i32, %arg2: memref<1x8x32xf32, #tpu.memory_space<vmem>>, %arg3: memref<1x8x32xf32, #tpu.memory_space<vmem>>, %arg4: memref<1x1x8xf32, #tpu.memory_space<vmem>>, %arg5: memref<4x32x8xbf16, #tpu.memory_space<vmem>>, %arg6: memref<4x1x8xf32, #tpu.memory_space<vmem>>, %arg7: memref<4x32x8xbf16, #tpu.memory_space<vmem>>, %arg8: memref<4x1x8xf32, #tpu.memory_space<vmem>>, %arg9: memref<4x32x8xbf16, #tpu.memory_space<vmem>>, %arg10: memref<4x1x8xf32, #tpu.memory_space<vmem>>, %arg11: memref<4x8x32xbf16, #tpu.memory_space<vmem>>, %arg12: memref<1x32xf32, #tpu.memory_space<vmem>>, %arg13: memref<1x32xf32, #tpu.memory_space<vmem>>, %arg14: memref<1x32xf32, #tpu.memory_space<vmem>>, %arg15: memref<32x64xbf16, #tpu.memory_space<vmem>>, %arg16: memref<1x64xf32, #tpu.memory_space<vmem>>, %arg17: memref<64x32xbf16, #tpu.memory_space<vmem>>, %arg18: memref<1x32xf32, #tpu.memory_space<vmem>>, %arg19: memref<1x32xf32, #tpu.memory_space<vmem>>, %arg20: memref<1x32xf32, #tpu.memory_space<vmem>>, %arg21: memref<1x8x32xf32, #tpu.memory_space<vmem>>, %arg22: memref<4x8x8xbf16, #tpu.memory_space<vmem>>, %arg23: memref<4x8x8xbf16, #tpu.memory_space<vmem>>) attributes {dimension_semantics = [#tpu.dimension_semantics<parallel>, #tpu.dimension_semantics<arbitrary>], iteration_bounds = array<i64: 2, 1>, scalar_prefetch = 0 : i64, scratch_operands = 2 : i64, tpu.core_type = #tpu.core_type<tc>, window_params = [{transform_indices = @transform_0, window_bounds = array<i64: 1, 8, 32>}, {transform_indices = @transform_1, window_bounds = array<i64: 1, 8, 32>}, {transform_indices = @transform_2, window_bounds = array<i64: 1, 1, 8>}, {pipeline_mode = #tpu.pipeline_mode<synchronous>, transform_indices = @transform_3, window_bounds = array<i64: 4, 32, 8>}, {pipeline_mode = #tpu.pipeline_mode<synchronous>, transform_indices = @transform_4, window_bounds = array<i64: 4, 1, 8>}, {pipeline_mode = #tpu.pipeline_mode<synchronous>, transform_indices = @transform_5, window_bounds = array<i64: 4, 32, 8>}, {pipeline_mode = #tpu.pipeline_mode<synchronous>, transform_indices = @transform_6, window_bounds = array<i64: 4, 1, 8>}, {pipeline_mode = #tpu.pipeline_mode<synchronous>, transform_indices = @transform_7, window_bounds = array<i64: 4, 32, 8>}, {pipeline_mode = #tpu.pipeline_mode<synchronous>, transform_indices = @transform_8, window_bounds = array<i64: 4, 1, 8>}, {pipeline_mode = #tpu.pipeline_mode<synchronous>, transform_indices = @transform_9, window_bounds = array<i64: 4, 8, 32>}, {pipeline_mode = #tpu.pipeline_mode<synchronous>, transform_indices = @transform_10, window_bounds = array<i64: 1, 32>}, {pipeline_mode = #tpu.pipeline_mode<synchronous>, transform_indices = @transform_11, window_bounds = array<i64: 1, 32>}, {pipeline_mode = #tpu.pipeline_mode<synchronous>, transform_indices = @transform_12, window_bounds = array<i64: 1, 32>}, {pipeline_mode = #tpu.pipeline_mode<synchronous>, transform_indices = @transform_13, window_bounds = array<i64: 32, 64>}, {pipeline_mode = #tpu.pipeline_mode<synchronous>, transform_indices = @transform_14, window_bounds = array<i64: 1, 64>}, {pipeline_mode = #tpu.pipeline_mode<synchronous>, transform_indices = @transform_15, window_bounds = array<i64: 64, 32>}, {pipeline_mode = #tpu.pipeline_mode<synchronous>, transform_indices = @transform_16, window_bounds = array<i64: 1, 32>}, {pipeline_mode = #tpu.pipeline_mode<synchronous>, transform_indices = @transform_17, window_bounds = array<i64: 1, 32>}, {pipeline_mode = #tpu.pipeline_mode<synchronous>, transform_indices = @transform_18, window_bounds = array<i64: 1, 32>}, {transform_indices = @transform_19, window_bounds = array<i64: 1, 8, 32>}]} {
    %c0_i32 = arith.constant 0 : i32
    %0 = arith.cmpi eq, %arg1, %c0_i32 : i32
    %1 = arith.extui %0 : i1 to i32
    %c0_i32_0 = arith.constant 0 : i32
    %2 = arith.cmpi ne, %1, %c0_i32_0 : i32
    scf.if %2 {
      %c0_127 = arith.constant 0 : index
      %c0_128 = arith.constant 0 : index
      %c0_129 = arith.constant 0 : index
      %235 = vector.load %arg3[%c0_127, %c0_128, %c0_129] : memref<1x8x32xf32, #tpu.memory_space<vmem>>, vector<1x8x32xf32>
      %236 = vector.shape_cast %235 : vector<1x8x32xf32> to vector<8x32xf32>
      %237 = arith.truncf %236 : vector<8x32xf32> to vector<8x32xbf16>
      %c0_130 = arith.constant 0 : index
      %c0_131 = arith.constant 0 : index
      %c0_132 = arith.constant 0 : index
      %238 = vector.load %arg7[%c0_130, %c0_131, %c0_132] : memref<4x32x8xbf16, #tpu.memory_space<vmem>>, vector<1x32x8xbf16>
      %239 = vector.shape_cast %238 : vector<1x32x8xbf16> to vector<32x8xbf16>
      %cst_133 = arith.constant dense<0.000000e+00> : vector<8x8xf32>
      %240 = tpu.matmul %237, %239, %cst_133 {dimension_numbers = #tpu.dot_dimension_numbers<[1], [0], [0], [1], [0, 0, 1, 1], [], []>} : vector<8x32xbf16>, vector<32x8xbf16>, vector<8x8xf32> -> vector<8x8xf32>
      %c0_134 = arith.constant 0 : index
      %c0_135 = arith.constant 0 : index
      %c0_136 = arith.constant 0 : index
      %241 = vector.load %arg8[%c0_134, %c0_135, %c0_136] : memref<4x1x8xf32, #tpu.memory_space<vmem>>, vector<1x1x8xf32>
      %242 = vector.shape_cast %241 : vector<1x1x8xf32> to vector<1x8xf32>
      %243 = vector.broadcast %242 : vector<1x8xf32> to vector<8x8xf32>
      %244 = arith.addf %240, %243 : vector<8x8xf32>
      %c0_137 = arith.constant 0 : index
      %c0_138 = arith.constant 0 : index
      %c0_139 = arith.constant 0 : index
      %245 = vector.load %arg9[%c0_137, %c0_138, %c0_139] : memref<4x32x8xbf16, #tpu.memory_space<vmem>>, vector<1x32x8xbf16>
      %246 = vector.shape_cast %245 : vector<1x32x8xbf16> to vector<32x8xbf16>
      %cst_140 = arith.constant dense<0.000000e+00> : vector<8x8xf32>
      %247 = tpu.matmul %237, %246, %cst_140 {dimension_numbers = #tpu.dot_dimension_numbers<[1], [0], [0], [1], [0, 0, 1, 1], [], []>} : vector<8x32xbf16>, vector<32x8xbf16>, vector<8x8xf32> -> vector<8x8xf32>
      %c0_141 = arith.constant 0 : index
      %c0_142 = arith.constant 0 : index
      %c0_143 = arith.constant 0 : index
      %248 = vector.load %arg10[%c0_141, %c0_142, %c0_143] : memref<4x1x8xf32, #tpu.memory_space<vmem>>, vector<1x1x8xf32>
      %249 = vector.shape_cast %248 : vector<1x1x8xf32> to vector<1x8xf32>
      %250 = vector.broadcast %249 : vector<1x8xf32> to vector<8x8xf32>
      %251 = arith.addf %247, %250 : vector<8x8xf32>
      %252 = arith.truncf %244 : vector<8x8xf32> to vector<8x8xbf16>
      %c0_144 = arith.constant 0 : index
      %c0_145 = arith.constant 0 : index
      %c0_146 = arith.constant 0 : index
      %253 = vector.load %arg22[%c0_144, %c0_145, %c0_146] : memref<4x8x8xbf16, #tpu.memory_space<vmem>>, vector<1x8x8xbf16>
      %254 = vector.shape_cast %253 : vector<1x8x8xbf16> to vector<8x8xbf16>
      %255 = vector.shape_cast %252 : vector<8x8xbf16> to vector<1x8x8xbf16>
      tpu.vector_store %arg22[%c0_144, %c0_145, %c0_146], %255 {strides = array<i32>} : memref<4x8x8xbf16, #tpu.memory_space<vmem>>, vector<1x8x8xbf16>,
      %256 = arith.truncf %251 : vector<8x8xf32> to vector<8x8xbf16>
      %c0_147 = arith.constant 0 : index
      %c0_148 = arith.constant 0 : index
      %c0_149 = arith.constant 0 : index
      %257 = vector.load %arg23[%c0_147, %c0_148, %c0_149] : memref<4x8x8xbf16, #tpu.memory_space<vmem>>, vector<1x8x8xbf16>
      %258 = vector.shape_cast %257 : vector<1x8x8xbf16> to vector<8x8xbf16>
      %259 = vector.shape_cast %256 : vector<8x8xbf16> to vector<1x8x8xbf16>
      tpu.vector_store %arg23[%c0_147, %c0_148, %c0_149], %259 {strides = array<i32>} : memref<4x8x8xbf16, #tpu.memory_space<vmem>>, vector<1x8x8xbf16>,
      %c1_150 = arith.constant 1 : index
      %c0_151 = arith.constant 0 : index
      %c0_152 = arith.constant 0 : index
      %260 = vector.load %arg7[%c1_150, %c0_151, %c0_152] : memref<4x32x8xbf16, #tpu.memory_space<vmem>>, vector<1x32x8xbf16>
      %261 = vector.shape_cast %260 : vector<1x32x8xbf16> to vector<32x8xbf16>
      %cst_153 = arith.constant dense<0.000000e+00> : vector<8x8xf32>
      %262 = tpu.matmul %237, %261, %cst_153 {dimension_numbers = #tpu.dot_dimension_numbers<[1], [0], [0], [1], [0, 0, 1, 1], [], []>} : vector<8x32xbf16>, vector<32x8xbf16>, vector<8x8xf32> -> vector<8x8xf32>
      %c1_154 = arith.constant 1 : index
      %c0_155 = arith.constant 0 : index
      %c0_156 = arith.constant 0 : index
      %263 = vector.load %arg8[%c1_154, %c0_155, %c0_156] : memref<4x1x8xf32, #tpu.memory_space<vmem>>, vector<1x1x8xf32>
      %264 = vector.shape_cast %263 : vector<1x1x8xf32> to vector<1x8xf32>
      %265 = vector.broadcast %264 : vector<1x8xf32> to vector<8x8xf32>
      %266 = arith.addf %262, %265 : vector<8x8xf32>
      %c1_157 = arith.constant 1 : index
      %c0_158 = arith.constant 0 : index
      %c0_159 = arith.constant 0 : index
      %267 = vector.load %arg9[%c1_157, %c0_158, %c0_159] : memref<4x32x8xbf16, #tpu.memory_space<vmem>>, vector<1x32x8xbf16>
      %268 = vector.shape_cast %267 : vector<1x32x8xbf16> to vector<32x8xbf16>
      %cst_160 = arith.constant dense<0.000000e+00> : vector<8x8xf32>
      %269 = tpu.matmul %237, %268, %cst_160 {dimension_numbers = #tpu.dot_dimension_numbers<[1], [0], [0], [1], [0, 0, 1, 1], [], []>} : vector<8x32xbf16>, vector<32x8xbf16>, vector<8x8xf32> -> vector<8x8xf32>
      %c1_161 = arith.constant 1 : index
      %c0_162 = arith.constant 0 : index
      %c0_163 = arith.constant 0 : index
      %270 = vector.load %arg10[%c1_161, %c0_162, %c0_163] : memref<4x1x8xf32, #tpu.memory_space<vmem>>, vector<1x1x8xf32>
      %271 = vector.shape_cast %270 : vector<1x1x8xf32> to vector<1x8xf32>
      %272 = vector.broadcast %271 : vector<1x8xf32> to vector<8x8xf32>
      %273 = arith.addf %269, %272 : vector<8x8xf32>
      %274 = arith.truncf %266 : vector<8x8xf32> to vector<8x8xbf16>
      %c1_164 = arith.constant 1 : index
      %c0_165 = arith.constant 0 : index
      %c0_166 = arith.constant 0 : index
      %275 = vector.load %arg22[%c1_164, %c0_165, %c0_166] : memref<4x8x8xbf16, #tpu.memory_space<vmem>>, vector<1x8x8xbf16>
      %276 = vector.shape_cast %275 : vector<1x8x8xbf16> to vector<8x8xbf16>
      %277 = vector.shape_cast %274 : vector<8x8xbf16> to vector<1x8x8xbf16>
      tpu.vector_store %arg22[%c1_164, %c0_165, %c0_166], %277 {strides = array<i32>} : memref<4x8x8xbf16, #tpu.memory_space<vmem>>, vector<1x8x8xbf16>,
      %278 = arith.truncf %273 : vector<8x8xf32> to vector<8x8xbf16>
      %c1_167 = arith.constant 1 : index
      %c0_168 = arith.constant 0 : index
      %c0_169 = arith.constant 0 : index
      %279 = vector.load %arg23[%c1_167, %c0_168, %c0_169] : memref<4x8x8xbf16, #tpu.memory_space<vmem>>, vector<1x8x8xbf16>
      %280 = vector.shape_cast %279 : vector<1x8x8xbf16> to vector<8x8xbf16>
      %281 = vector.shape_cast %278 : vector<8x8xbf16> to vector<1x8x8xbf16>
      tpu.vector_store %arg23[%c1_167, %c0_168, %c0_169], %281 {strides = array<i32>} : memref<4x8x8xbf16, #tpu.memory_space<vmem>>, vector<1x8x8xbf16>,
      %c2_170 = arith.constant 2 : index
      %c0_171 = arith.constant 0 : index
      %c0_172 = arith.constant 0 : index
      %282 = vector.load %arg7[%c2_170, %c0_171, %c0_172] : memref<4x32x8xbf16, #tpu.memory_space<vmem>>, vector<1x32x8xbf16>
      %283 = vector.shape_cast %282 : vector<1x32x8xbf16> to vector<32x8xbf16>
      %cst_173 = arith.constant dense<0.000000e+00> : vector<8x8xf32>
      %284 = tpu.matmul %237, %283, %cst_173 {dimension_numbers = #tpu.dot_dimension_numbers<[1], [0], [0], [1], [0, 0, 1, 1], [], []>} : vector<8x32xbf16>, vector<32x8xbf16>, vector<8x8xf32> -> vector<8x8xf32>
      %c2_174 = arith.constant 2 : index
      %c0_175 = arith.constant 0 : index
      %c0_176 = arith.constant 0 : index
      %285 = vector.load %arg8[%c2_174, %c0_175, %c0_176] : memref<4x1x8xf32, #tpu.memory_space<vmem>>, vector<1x1x8xf32>
      %286 = vector.shape_cast %285 : vector<1x1x8xf32> to vector<1x8xf32>
      %287 = vector.broadcast %286 : vector<1x8xf32> to vector<8x8xf32>
      %288 = arith.addf %284, %287 : vector<8x8xf32>
      %c2_177 = arith.constant 2 : index
      %c0_178 = arith.constant 0 : index
      %c0_179 = arith.constant 0 : index
      %289 = vector.load %arg9[%c2_177, %c0_178, %c0_179] : memref<4x32x8xbf16, #tpu.memory_space<vmem>>, vector<1x32x8xbf16>
      %290 = vector.shape_cast %289 : vector<1x32x8xbf16> to vector<32x8xbf16>
      %cst_180 = arith.constant dense<0.000000e+00> : vector<8x8xf32>
      %291 = tpu.matmul %237, %290, %cst_180 {dimension_numbers = #tpu.dot_dimension_numbers<[1], [0], [0], [1], [0, 0, 1, 1], [], []>} : vector<8x32xbf16>, vector<32x8xbf16>, vector<8x8xf32> -> vector<8x8xf32>
      %c2_181 = arith.constant 2 : index
      %c0_182 = arith.constant 0 : index
      %c0_183 = arith.constant 0 : index
      %292 = vector.load %arg10[%c2_181, %c0_182, %c0_183] : memref<4x1x8xf32, #tpu.memory_space<vmem>>, vector<1x1x8xf32>
      %293 = vector.shape_cast %292 : vector<1x1x8xf32> to vector<1x8xf32>
      %294 = vector.broadcast %293 : vector<1x8xf32> to vector<8x8xf32>
      %295 = arith.addf %291, %294 : vector<8x8xf32>
      %296 = arith.truncf %288 : vector<8x8xf32> to vector<8x8xbf16>
      %c2_184 = arith.constant 2 : index
      %c0_185 = arith.constant 0 : index
      %c0_186 = arith.constant 0 : index
      %297 = vector.load %arg22[%c2_184, %c0_185, %c0_186] : memref<4x8x8xbf16, #tpu.memory_space<vmem>>, vector<1x8x8xbf16>
      %298 = vector.shape_cast %297 : vector<1x8x8xbf16> to vector<8x8xbf16>
      %299 = vector.shape_cast %296 : vector<8x8xbf16> to vector<1x8x8xbf16>
      tpu.vector_store %arg22[%c2_184, %c0_185, %c0_186], %299 {strides = array<i32>} : memref<4x8x8xbf16, #tpu.memory_space<vmem>>, vector<1x8x8xbf16>,
      %300 = arith.truncf %295 : vector<8x8xf32> to vector<8x8xbf16>
      %c2_187 = arith.constant 2 : index
      %c0_188 = arith.constant 0 : index
      %c0_189 = arith.constant 0 : index
      %301 = vector.load %arg23[%c2_187, %c0_188, %c0_189] : memref<4x8x8xbf16, #tpu.memory_space<vmem>>, vector<1x8x8xbf16>
      %302 = vector.shape_cast %301 : vector<1x8x8xbf16> to vector<8x8xbf16>
      %303 = vector.shape_cast %300 : vector<8x8xbf16> to vector<1x8x8xbf16>
      tpu.vector_store %arg23[%c2_187, %c0_188, %c0_189], %303 {strides = array<i32>} : memref<4x8x8xbf16, #tpu.memory_space<vmem>>, vector<1x8x8xbf16>,
      %c3_190 = arith.constant 3 : index
      %c0_191 = arith.constant 0 : index
      %c0_192 = arith.constant 0 : index
      %304 = vector.load %arg7[%c3_190, %c0_191, %c0_192] : memref<4x32x8xbf16, #tpu.memory_space<vmem>>, vector<1x32x8xbf16>
      %305 = vector.shape_cast %304 : vector<1x32x8xbf16> to vector<32x8xbf16>
      %cst_193 = arith.constant dense<0.000000e+00> : vector<8x8xf32>
      %306 = tpu.matmul %237, %305, %cst_193 {dimension_numbers = #tpu.dot_dimension_numbers<[1], [0], [0], [1], [0, 0, 1, 1], [], []>} : vector<8x32xbf16>, vector<32x8xbf16>, vector<8x8xf32> -> vector<8x8xf32>
      %c3_194 = arith.constant 3 : index
      %c0_195 = arith.constant 0 : index
      %c0_196 = arith.constant 0 : index
      %307 = vector.load %arg8[%c3_194, %c0_195, %c0_196] : memref<4x1x8xf32, #tpu.memory_space<vmem>>, vector<1x1x8xf32>
      %308 = vector.shape_cast %307 : vector<1x1x8xf32> to vector<1x8xf32>
      %309 = vector.broadcast %308 : vector<1x8xf32> to vector<8x8xf32>
      %310 = arith.addf %306, %309 : vector<8x8xf32>
      %c3_197 = arith.constant 3 : index
      %c0_198 = arith.constant 0 : index
      %c0_199 = arith.constant 0 : index
      %311 = vector.load %arg9[%c3_197, %c0_198, %c0_199] : memref<4x32x8xbf16, #tpu.memory_space<vmem>>, vector<1x32x8xbf16>
      %312 = vector.shape_cast %311 : vector<1x32x8xbf16> to vector<32x8xbf16>
      %cst_200 = arith.constant dense<0.000000e+00> : vector<8x8xf32>
      %313 = tpu.matmul %237, %312, %cst_200 {dimension_numbers = #tpu.dot_dimension_numbers<[1], [0], [0], [1], [0, 0, 1, 1], [], []>} : vector<8x32xbf16>, vector<32x8xbf16>, vector<8x8xf32> -> vector<8x8xf32>
      %c3_201 = arith.constant 3 : index
      %c0_202 = arith.constant 0 : index
      %c0_203 = arith.constant 0 : index
      %314 = vector.load %arg10[%c3_201, %c0_202, %c0_203] : memref<4x1x8xf32, #tpu.memory_space<vmem>>, vector<1x1x8xf32>
      %315 = vector.shape_cast %314 : vector<1x1x8xf32> to vector<1x8xf32>
      %316 = vector.broadcast %315 : vector<1x8xf32> to vector<8x8xf32>
      %317 = arith.addf %313, %316 : vector<8x8xf32>
      %318 = arith.truncf %310 : vector<8x8xf32> to vector<8x8xbf16>
      %c3_204 = arith.constant 3 : index
      %c0_205 = arith.constant 0 : index
      %c0_206 = arith.constant 0 : index
      %319 = vector.load %arg22[%c3_204, %c0_205, %c0_206] : memref<4x8x8xbf16, #tpu.memory_space<vmem>>, vector<1x8x8xbf16>
      %320 = vector.shape_cast %319 : vector<1x8x8xbf16> to vector<8x8xbf16>
      %321 = vector.shape_cast %318 : vector<8x8xbf16> to vector<1x8x8xbf16>
      tpu.vector_store %arg22[%c3_204, %c0_205, %c0_206], %321 {strides = array<i32>} : memref<4x8x8xbf16, #tpu.memory_space<vmem>>, vector<1x8x8xbf16>,
      %322 = arith.truncf %317 : vector<8x8xf32> to vector<8x8xbf16>
      %c3_207 = arith.constant 3 : index
      %c0_208 = arith.constant 0 : index
      %c0_209 = arith.constant 0 : index
      %323 = vector.load %arg23[%c3_207, %c0_208, %c0_209] : memref<4x8x8xbf16, #tpu.memory_space<vmem>>, vector<1x8x8xbf16>
      %324 = vector.shape_cast %323 : vector<1x8x8xbf16> to vector<8x8xbf16>
      %325 = vector.shape_cast %322 : vector<8x8xbf16> to vector<1x8x8xbf16>
      tpu.vector_store %arg23[%c3_207, %c0_208, %c0_209], %325 {strides = array<i32>} : memref<4x8x8xbf16, #tpu.memory_space<vmem>>, vector<1x8x8xbf16>,
    } else {
    }
    %c0 = arith.constant 0 : index
    %c0_1 = arith.constant 0 : index
    %c0_2 = arith.constant 0 : index
    %3 = vector.load %arg2[%c0, %c0_1, %c0_2] : memref<1x8x32xf32, #tpu.memory_space<vmem>>, vector<1x8x32xf32>
    %4 = vector.shape_cast %3 : vector<1x8x32xf32> to vector<8x32xf32>
    %5 = arith.truncf %4 : vector<8x32xf32> to vector<8x32xbf16>
    %c0_3 = arith.constant 0 : index
    %c0_4 = arith.constant 0 : index
    %c0_5 = arith.constant 0 : index
    %6 = vector.load %arg4[%c0_3, %c0_4, %c0_5] : memref<1x1x8xf32, #tpu.memory_space<vmem>>, vector<1x1x8xf32>
    %7 = vector.shape_cast %6 : vector<1x1x8xf32> to vector<1x8xf32>
    %cst = arith.constant 0.000000e+00 : f32
    %8 = vector.broadcast %cst : f32 to vector<8x32xf32>
    %c0_6 = arith.constant 0 : index
    %c0_7 = arith.constant 0 : index
    %c0_8 = arith.constant 0 : index
    %9 = vector.load %arg5[%c0_6, %c0_7, %c0_8] : memref<4x32x8xbf16, #tpu.memory_space<vmem>>, vector<1x32x8xbf16>
    %10 = vector.shape_cast %9 : vector<1x32x8xbf16> to vector<32x8xbf16>
    %cst_9 = arith.constant dense<0.000000e+00> : vector<8x8xf32>
    %11 = tpu.matmul %5, %10, %cst_9 {dimension_numbers = #tpu.dot_dimension_numbers<[1], [0], [0], [1], [0, 0, 1, 1], [], []>} : vector<8x32xbf16>, vector<32x8xbf16>, vector<8x8xf32> -> vector<8x8xf32>
    %c0_10 = arith.constant 0 : index
    %c0_11 = arith.constant 0 : index
    %c0_12 = arith.constant 0 : index
    %12 = vector.load %arg6[%c0_10, %c0_11, %c0_12] : memref<4x1x8xf32, #tpu.memory_space<vmem>>, vector<1x1x8xf32>
    %13 = vector.shape_cast %12 : vector<1x1x8xf32> to vector<1x8xf32>
    %14 = vector.broadcast %13 : vector<1x8xf32> to vector<8x8xf32>
    %15 = arith.addf %11, %14 : vector<8x8xf32>
    %cst_13 = arith.constant 0.353553385 : f32
    %16 = vector.broadcast %cst_13 : f32 to vector<8x8xf32>
    %17 = arith.mulf %15, %16 : vector<8x8xf32>
    %18 = arith.truncf %17 : vector<8x8xf32> to vector<8x8xbf16>
    %c0_14 = arith.constant 0 : index
    %c0_15 = arith.constant 0 : index
    %c0_16 = arith.constant 0 : index
    %19 = vector.load %arg22[%c0_14, %c0_15, %c0_16] : memref<4x8x8xbf16, #tpu.memory_space<vmem>>, vector<1x8x8xbf16>
    %20 = vector.shape_cast %19 : vector<1x8x8xbf16> to vector<8x8xbf16>
    %cst_17 = arith.constant dense<0.000000e+00> : vector<8x8xf32>
    %21 = tpu.matmul %18, %20, %cst_17 {dimension_numbers = #tpu.dot_dimension_numbers<[1], [1], [0], [0], [0, 0, 1, 0], [], []>} : vector<8x8xbf16>, vector<8x8xbf16>, vector<8x8xf32> -> vector<8x8xf32>
    %22 = vector.broadcast %7 : vector<1x8xf32> to vector<8x8xf32>
    %23 = arith.addf %21, %22 : vector<8x8xf32>
    %cst_18 = arith.constant dense<0xFF800000> : vector<8xf32>
    %24 = vector.multi_reduction <maximumf>, %23, %cst_18 [1] : vector<8x8xf32> to vector<8xf32>
    %25 = vector.shape_cast %24 : vector<8xf32> to vector<8x1xf32>
    %26 = vector.broadcast %25 : vector<8x1xf32> to vector<8x8xf32>
    %27 = arith.subf %23, %26 : vector<8x8xf32>
    %28 = math.exp %27 : vector<8x8xf32>
    %cst_19 = arith.constant dense<0.000000e+00> : vector<8xf32>
    %29 = vector.multi_reduction <add>, %28, %cst_19 [1] : vector<8x8xf32> to vector<8xf32>
    %30 = vector.shape_cast %29 : vector<8xf32> to vector<8x1xf32>
    %31 = tpu.reciprocal %30 {approx = true} : vector<8x1xf32> -> vector<8x1xf32>
    %32 = vector.broadcast %31 : vector<8x1xf32> to vector<8x8xf32>
    %33 = arith.mulf %28, %32 : vector<8x8xf32>
    %34 = arith.truncf %33 : vector<8x8xf32> to vector<8x8xbf16>
    %c0_20 = arith.constant 0 : index
    %c0_21 = arith.constant 0 : index
    %c0_22 = arith.constant 0 : index
    %35 = vector.load %arg23[%c0_20, %c0_21, %c0_22] : memref<4x8x8xbf16, #tpu.memory_space<vmem>>, vector<1x8x8xbf16>
    %36 = vector.shape_cast %35 : vector<1x8x8xbf16> to vector<8x8xbf16>
    %cst_23 = arith.constant dense<0.000000e+00> : vector<8x8xf32>
    %37 = tpu.matmul %34, %36, %cst_23 {dimension_numbers = #tpu.dot_dimension_numbers<[1], [0], [0], [1], [0, 0, 1, 1], [], []>} : vector<8x8xbf16>, vector<8x8xbf16>, vector<8x8xf32> -> vector<8x8xf32>
    %38 = arith.truncf %37 : vector<8x8xf32> to vector<8x8xbf16>
    %c0_24 = arith.constant 0 : index
    %c0_25 = arith.constant 0 : index
    %c0_26 = arith.constant 0 : index
    %39 = vector.load %arg11[%c0_24, %c0_25, %c0_26] : memref<4x8x32xbf16, #tpu.memory_space<vmem>>, vector<1x8x32xbf16>
    %40 = vector.shape_cast %39 : vector<1x8x32xbf16> to vector<8x32xbf16>
    %cst_27 = arith.constant dense<0.000000e+00> : vector<8x32xf32>
    %41 = tpu.matmul %38, %40, %cst_27 {dimension_numbers = #tpu.dot_dimension_numbers<[1], [0], [0], [1], [0, 0, 1, 1], [], []>} : vector<8x8xbf16>, vector<8x32xbf16>, vector<8x32xf32> -> vector<8x32xf32>
    %42 = arith.addf %8, %41 : vector<8x32xf32>
    %c1 = arith.constant 1 : index
    %c0_28 = arith.constant 0 : index
    %c0_29 = arith.constant 0 : index
    %43 = vector.load %arg5[%c1, %c0_28, %c0_29] : memref<4x32x8xbf16, #tpu.memory_space<vmem>>, vector<1x32x8xbf16>
    %44 = vector.shape_cast %43 : vector<1x32x8xbf16> to vector<32x8xbf16>
    %cst_30 = arith.constant dense<0.000000e+00> : vector<8x8xf32>
    %45 = tpu.matmul %5, %44, %cst_30 {dimension_numbers = #tpu.dot_dimension_numbers<[1], [0], [0], [1], [0, 0, 1, 1], [], []>} : vector<8x32xbf16>, vector<32x8xbf16>, vector<8x8xf32> -> vector<8x8xf32>
    %c1_31 = arith.constant 1 : index
    %c0_32 = arith.constant 0 : index
    %c0_33 = arith.constant 0 : index
    %46 = vector.load %arg6[%c1_31, %c0_32, %c0_33] : memref<4x1x8xf32, #tpu.memory_space<vmem>>, vector<1x1x8xf32>
    %47 = vector.shape_cast %46 : vector<1x1x8xf32> to vector<1x8xf32>
    %48 = vector.broadcast %47 : vector<1x8xf32> to vector<8x8xf32>
    %49 = arith.addf %45, %48 : vector<8x8xf32>
    %cst_34 = arith.constant 0.353553385 : f32
    %50 = vector.broadcast %cst_34 : f32 to vector<8x8xf32>
    %51 = arith.mulf %49, %50 : vector<8x8xf32>
    %52 = arith.truncf %51 : vector<8x8xf32> to vector<8x8xbf16>
    %c1_35 = arith.constant 1 : index
    %c0_36 = arith.constant 0 : index
    %c0_37 = arith.constant 0 : index
    %53 = vector.load %arg22[%c1_35, %c0_36, %c0_37] : memref<4x8x8xbf16, #tpu.memory_space<vmem>>, vector<1x8x8xbf16>
    %54 = vector.shape_cast %53 : vector<1x8x8xbf16> to vector<8x8xbf16>
    %cst_38 = arith.constant dense<0.000000e+00> : vector<8x8xf32>
    %55 = tpu.matmul %52, %54, %cst_38 {dimension_numbers = #tpu.dot_dimension_numbers<[1], [1], [0], [0], [0, 0, 1, 0], [], []>} : vector<8x8xbf16>, vector<8x8xbf16>, vector<8x8xf32> -> vector<8x8xf32>
    %56 = vector.broadcast %7 : vector<1x8xf32> to vector<8x8xf32>
    %57 = arith.addf %55, %56 : vector<8x8xf32>
    %cst_39 = arith.constant dense<0xFF800000> : vector<8xf32>
    %58 = vector.multi_reduction <maximumf>, %57, %cst_39 [1] : vector<8x8xf32> to vector<8xf32>
    %59 = vector.shape_cast %58 : vector<8xf32> to vector<8x1xf32>
    %60 = vector.broadcast %59 : vector<8x1xf32> to vector<8x8xf32>
    %61 = arith.subf %57, %60 : vector<8x8xf32>
    %62 = math.exp %61 : vector<8x8xf32>
    %cst_40 = arith.constant dense<0.000000e+00> : vector<8xf32>
    %63 = vector.multi_reduction <add>, %62, %cst_40 [1] : vector<8x8xf32> to vector<8xf32>
    %64 = vector.shape_cast %63 : vector<8xf32> to vector<8x1xf32>
    %65 = tpu.reciprocal %64 {approx = true} : vector<8x1xf32> -> vector<8x1xf32>
    %66 = vector.broadcast %65 : vector<8x1xf32> to vector<8x8xf32>
    %67 = arith.mulf %62, %66 : vector<8x8xf32>
    %68 = arith.truncf %67 : vector<8x8xf32> to vector<8x8xbf16>
    %c1_41 = arith.constant 1 : index
    %c0_42 = arith.constant 0 : index
    %c0_43 = arith.constant 0 : index
    %69 = vector.load %arg23[%c1_41, %c0_42, %c0_43] : memref<4x8x8xbf16, #tpu.memory_space<vmem>>, vector<1x8x8xbf16>
    %70 = vector.shape_cast %69 : vector<1x8x8xbf16> to vector<8x8xbf16>
    %cst_44 = arith.constant dense<0.000000e+00> : vector<8x8xf32>
    %71 = tpu.matmul %68, %70, %cst_44 {dimension_numbers = #tpu.dot_dimension_numbers<[1], [0], [0], [1], [0, 0, 1, 1], [], []>} : vector<8x8xbf16>, vector<8x8xbf16>, vector<8x8xf32> -> vector<8x8xf32>
    %72 = arith.truncf %71 : vector<8x8xf32> to vector<8x8xbf16>
    %c1_45 = arith.constant 1 : index
    %c0_46 = arith.constant 0 : index
    %c0_47 = arith.constant 0 : index
    %73 = vector.load %arg11[%c1_45, %c0_46, %c0_47] : memref<4x8x32xbf16, #tpu.memory_space<vmem>>, vector<1x8x32xbf16>
    %74 = vector.shape_cast %73 : vector<1x8x32xbf16> to vector<8x32xbf16>
    %cst_48 = arith.constant dense<0.000000e+00> : vector<8x32xf32>
    %75 = tpu.matmul %72, %74, %cst_48 {dimension_numbers = #tpu.dot_dimension_numbers<[1], [0], [0], [1], [0, 0, 1, 1], [], []>} : vector<8x8xbf16>, vector<8x32xbf16>, vector<8x32xf32> -> vector<8x32xf32>
    %76 = arith.addf %42, %75 : vector<8x32xf32>
    %c2 = arith.constant 2 : index
    %c0_49 = arith.constant 0 : index
    %c0_50 = arith.constant 0 : index
    %77 = vector.load %arg5[%c2, %c0_49, %c0_50] : memref<4x32x8xbf16, #tpu.memory_space<vmem>>, vector<1x32x8xbf16>
    %78 = vector.shape_cast %77 : vector<1x32x8xbf16> to vector<32x8xbf16>
    %cst_51 = arith.constant dense<0.000000e+00> : vector<8x8xf32>
    %79 = tpu.matmul %5, %78, %cst_51 {dimension_numbers = #tpu.dot_dimension_numbers<[1], [0], [0], [1], [0, 0, 1, 1], [], []>} : vector<8x32xbf16>, vector<32x8xbf16>, vector<8x8xf32> -> vector<8x8xf32>
    %c2_52 = arith.constant 2 : index
    %c0_53 = arith.constant 0 : index
    %c0_54 = arith.constant 0 : index
    %80 = vector.load %arg6[%c2_52, %c0_53, %c0_54] : memref<4x1x8xf32, #tpu.memory_space<vmem>>, vector<1x1x8xf32>
    %81 = vector.shape_cast %80 : vector<1x1x8xf32> to vector<1x8xf32>
    %82 = vector.broadcast %81 : vector<1x8xf32> to vector<8x8xf32>
    %83 = arith.addf %79, %82 : vector<8x8xf32>
    %cst_55 = arith.constant 0.353553385 : f32
    %84 = vector.broadcast %cst_55 : f32 to vector<8x8xf32>
    %85 = arith.mulf %83, %84 : vector<8x8xf32>
    %86 = arith.truncf %85 : vector<8x8xf32> to vector<8x8xbf16>
    %c2_56 = arith.constant 2 : index
    %c0_57 = arith.constant 0 : index
    %c0_58 = arith.constant 0 : index
    %87 = vector.load %arg22[%c2_56, %c0_57, %c0_58] : memref<4x8x8xbf16, #tpu.memory_space<vmem>>, vector<1x8x8xbf16>
    %88 = vector.shape_cast %87 : vector<1x8x8xbf16> to vector<8x8xbf16>
    %cst_59 = arith.constant dense<0.000000e+00> : vector<8x8xf32>
    %89 = tpu.matmul %86, %88, %cst_59 {dimension_numbers = #tpu.dot_dimension_numbers<[1], [1], [0], [0], [0, 0, 1, 0], [], []>} : vector<8x8xbf16>, vector<8x8xbf16>, vector<8x8xf32> -> vector<8x8xf32>
    %90 = vector.broadcast %7 : vector<1x8xf32> to vector<8x8xf32>
    %91 = arith.addf %89, %90 : vector<8x8xf32>
    %cst_60 = arith.constant dense<0xFF800000> : vector<8xf32>
    %92 = vector.multi_reduction <maximumf>, %91, %cst_60 [1] : vector<8x8xf32> to vector<8xf32>
    %93 = vector.shape_cast %92 : vector<8xf32> to vector<8x1xf32>
    %94 = vector.broadcast %93 : vector<8x1xf32> to vector<8x8xf32>
    %95 = arith.subf %91, %94 : vector<8x8xf32>
    %96 = math.exp %95 : vector<8x8xf32>
    %cst_61 = arith.constant dense<0.000000e+00> : vector<8xf32>
    %97 = vector.multi_reduction <add>, %96, %cst_61 [1] : vector<8x8xf32> to vector<8xf32>
    %98 = vector.shape_cast %97 : vector<8xf32> to vector<8x1xf32>
    %99 = tpu.reciprocal %98 {approx = true} : vector<8x1xf32> -> vector<8x1xf32>
    %100 = vector.broadcast %99 : vector<8x1xf32> to vector<8x8xf32>
    %101 = arith.mulf %96, %100 : vector<8x8xf32>
    %102 = arith.truncf %101 : vector<8x8xf32> to vector<8x8xbf16>
    %c2_62 = arith.constant 2 : index
    %c0_63 = arith.constant 0 : index
    %c0_64 = arith.constant 0 : index
    %103 = vector.load %arg23[%c2_62, %c0_63, %c0_64] : memref<4x8x8xbf16, #tpu.memory_space<vmem>>, vector<1x8x8xbf16>
    %104 = vector.shape_cast %103 : vector<1x8x8xbf16> to vector<8x8xbf16>
    %cst_65 = arith.constant dense<0.000000e+00> : vector<8x8xf32>
    %105 = tpu.matmul %102, %104, %cst_65 {dimension_numbers = #tpu.dot_dimension_numbers<[1], [0], [0], [1], [0, 0, 1, 1], [], []>} : vector<8x8xbf16>, vector<8x8xbf16>, vector<8x8xf32> -> vector<8x8xf32>
    %106 = arith.truncf %105 : vector<8x8xf32> to vector<8x8xbf16>
    %c2_66 = arith.constant 2 : index
    %c0_67 = arith.constant 0 : index
    %c0_68 = arith.constant 0 : index
    %107 = vector.load %arg11[%c2_66, %c0_67, %c0_68] : memref<4x8x32xbf16, #tpu.memory_space<vmem>>, vector<1x8x32xbf16>
    %108 = vector.shape_cast %107 : vector<1x8x32xbf16> to vector<8x32xbf16>
    %cst_69 = arith.constant dense<0.000000e+00> : vector<8x32xf32>
    %109 = tpu.matmul %106, %108, %cst_69 {dimension_numbers = #tpu.dot_dimension_numbers<[1], [0], [0], [1], [0, 0, 1, 1], [], []>} : vector<8x8xbf16>, vector<8x32xbf16>, vector<8x32xf32> -> vector<8x32xf32>
    %110 = arith.addf %76, %109 : vector<8x32xf32>
    %c3 = arith.constant 3 : index
    %c0_70 = arith.constant 0 : index
    %c0_71 = arith.constant 0 : index
    %111 = vector.load %arg5[%c3, %c0_70, %c0_71] : memref<4x32x8xbf16, #tpu.memory_space<vmem>>, vector<1x32x8xbf16>
    %112 = vector.shape_cast %111 : vector<1x32x8xbf16> to vector<32x8xbf16>
    %cst_72 = arith.constant dense<0.000000e+00> : vector<8x8xf32>
    %113 = tpu.matmul %5, %112, %cst_72 {dimension_numbers = #tpu.dot_dimension_numbers<[1], [0], [0], [1], [0, 0, 1, 1], [], []>} : vector<8x32xbf16>, vector<32x8xbf16>, vector<8x8xf32> -> vector<8x8xf32>
    %c3_73 = arith.constant 3 : index
    %c0_74 = arith.constant 0 : index
    %c0_75 = arith.constant 0 : index
    %114 = vector.load %arg6[%c3_73, %c0_74, %c0_75] : memref<4x1x8xf32, #tpu.memory_space<vmem>>, vector<1x1x8xf32>
    %115 = vector.shape_cast %114 : vector<1x1x8xf32> to vector<1x8xf32>
    %116 = vector.broadcast %115 : vector<1x8xf32> to vector<8x8xf32>
    %117 = arith.addf %113, %116 : vector<8x8xf32>
    %cst_76 = arith.constant 0.353553385 : f32
    %118 = vector.broadcast %cst_76 : f32 to vector<8x8xf32>
    %119 = arith.mulf %117, %118 : vector<8x8xf32>
    %120 = arith.truncf %119 : vector<8x8xf32> to vector<8x8xbf16>
    %c3_77 = arith.constant 3 : index
    %c0_78 = arith.constant 0 : index
    %c0_79 = arith.constant 0 : index
    %121 = vector.load %arg22[%c3_77, %c0_78, %c0_79] : memref<4x8x8xbf16, #tpu.memory_space<vmem>>, vector<1x8x8xbf16>
    %122 = vector.shape_cast %121 : vector<1x8x8xbf16> to vector<8x8xbf16>
    %cst_80 = arith.constant dense<0.000000e+00> : vector<8x8xf32>
    %123 = tpu.matmul %120, %122, %cst_80 {dimension_numbers = #tpu.dot_dimension_numbers<[1], [1], [0], [0], [0, 0, 1, 0], [], []>} : vector<8x8xbf16>, vector<8x8xbf16>, vector<8x8xf32> -> vector<8x8xf32>
    %124 = vector.broadcast %7 : vector<1x8xf32> to vector<8x8xf32>
    %125 = arith.addf %123, %124 : vector<8x8xf32>
    %cst_81 = arith.constant dense<0xFF800000> : vector<8xf32>
    %126 = vector.multi_reduction <maximumf>, %125, %cst_81 [1] : vector<8x8xf32> to vector<8xf32>
    %127 = vector.shape_cast %126 : vector<8xf32> to vector<8x1xf32>
    %128 = vector.broadcast %127 : vector<8x1xf32> to vector<8x8xf32>
    %129 = arith.subf %125, %128 : vector<8x8xf32>
    %130 = math.exp %129 : vector<8x8xf32>
    %cst_82 = arith.constant dense<0.000000e+00> : vector<8xf32>
    %131 = vector.multi_reduction <add>, %130, %cst_82 [1] : vector<8x8xf32> to vector<8xf32>
    %132 = vector.shape_cast %131 : vector<8xf32> to vector<8x1xf32>
    %133 = tpu.reciprocal %132 {approx = true} : vector<8x1xf32> -> vector<8x1xf32>
    %134 = vector.broadcast %133 : vector<8x1xf32> to vector<8x8xf32>
    %135 = arith.mulf %130, %134 : vector<8x8xf32>
    %136 = arith.truncf %135 : vector<8x8xf32> to vector<8x8xbf16>
    %c3_83 = arith.constant 3 : index
    %c0_84 = arith.constant 0 : index
    %c0_85 = arith.constant 0 : index
    %137 = vector.load %arg23[%c3_83, %c0_84, %c0_85] : memref<4x8x8xbf16, #tpu.memory_space<vmem>>, vector<1x8x8xbf16>
    %138 = vector.shape_cast %137 : vector<1x8x8xbf16> to vector<8x8xbf16>
    %cst_86 = arith.constant dense<0.000000e+00> : vector<8x8xf32>
    %139 = tpu.matmul %136, %138, %cst_86 {dimension_numbers = #tpu.dot_dimension_numbers<[1], [0], [0], [1], [0, 0, 1, 1], [], []>} : vector<8x8xbf16>, vector<8x8xbf16>, vector<8x8xf32> -> vector<8x8xf32>
    %140 = arith.truncf %139 : vector<8x8xf32> to vector<8x8xbf16>
    %c3_87 = arith.constant 3 : index
    %c0_88 = arith.constant 0 : index
    %c0_89 = arith.constant 0 : index
    %141 = vector.load %arg11[%c3_87, %c0_88, %c0_89] : memref<4x8x32xbf16, #tpu.memory_space<vmem>>, vector<1x8x32xbf16>
    %142 = vector.shape_cast %141 : vector<1x8x32xbf16> to vector<8x32xbf16>
    %cst_90 = arith.constant dense<0.000000e+00> : vector<8x32xf32>
    %143 = tpu.matmul %140, %142, %cst_90 {dimension_numbers = #tpu.dot_dimension_numbers<[1], [0], [0], [1], [0, 0, 1, 1], [], []>} : vector<8x8xbf16>, vector<8x32xbf16>, vector<8x32xf32> -> vector<8x32xf32>
    %144 = arith.addf %110, %143 : vector<8x32xf32>
    %c0_91 = arith.constant 0 : index
    %c0_92 = arith.constant 0 : index
    %145 = vector.load %arg12[%c0_91, %c0_92] : memref<1x32xf32, #tpu.memory_space<vmem>>, vector<1x32xf32>
    %146 = vector.shape_cast %145 : vector<1x32xf32> to vector<32xf32>
    %147 = vector.shape_cast %146 : vector<32xf32> to vector<1x32xf32>
    %148 = vector.broadcast %147 : vector<1x32xf32> to vector<8x32xf32>
    %149 = arith.addf %144, %148 : vector<8x32xf32>
    %150 = arith.addf %149, %4 : vector<8x32xf32>
    %c0_93 = arith.constant 0 : index
    %c0_94 = arith.constant 0 : index
    %151 = vector.load %arg13[%c0_93, %c0_94] : memref<1x32xf32, #tpu.memory_space<vmem>>, vector<1x32xf32>
    %152 = vector.shape_cast %151 : vector<1x32xf32> to vector<32xf32>
    %c0_95 = arith.constant 0 : index
    %c0_96 = arith.constant 0 : index
    %153 = vector.load %arg14[%c0_95, %c0_96] : memref<1x32xf32, #tpu.memory_space<vmem>>, vector<1x32xf32>
    %154 = vector.shape_cast %153 : vector<1x32xf32> to vector<32xf32>
    %cst_97 = arith.constant dense<0.000000e+00> : vector<8xf32>
    %155 = vector.multi_reduction <add>, %150, %cst_97 [1] : vector<8x32xf32> to vector<8xf32>
    %156 = vector.shape_cast %155 : vector<8xf32> to vector<8x1xf32>
    %cst_98 = arith.constant 3.200000e+01 : f32
    %157 = vector.broadcast %cst_98 : f32 to vector<8x1xf32>
    %158 = arith.divf %156, %157 : vector<8x1xf32>
    %159 = vector.broadcast %158 : vector<8x1xf32> to vector<8x32xf32>
    %160 = arith.subf %150, %159 : vector<8x32xf32>
    %161 = arith.mulf %160, %160 : vector<8x32xf32>
    %cst_99 = arith.constant dense<0.000000e+00> : vector<8xf32>
    %162 = vector.multi_reduction <add>, %161, %cst_99 [1] : vector<8x32xf32> to vector<8xf32>
    %163 = vector.shape_cast %162 : vector<8xf32> to vector<8x1xf32>
    %cst_100 = arith.constant 3.200000e+01 : f32
    %164 = vector.broadcast %cst_100 : f32 to vector<8x1xf32>
    %165 = arith.divf %163, %164 : vector<8x1xf32>
    %166 = vector.broadcast %158 : vector<8x1xf32> to vector<8x32xf32>
    %167 = arith.subf %150, %166 : vector<8x32xf32>
    %cst_101 = arith.constant 9.99999996E-13 : f32
    %168 = vector.broadcast %cst_101 : f32 to vector<8x1xf32>
    %169 = arith.addf %165, %168 : vector<8x1xf32>
    %170 = math.rsqrt %169 : vector<8x1xf32>
    %171 = vector.broadcast %170 : vector<8x1xf32> to vector<8x32xf32>
    %172 = arith.mulf %167, %171 : vector<8x32xf32>
    %173 = vector.shape_cast %152 : vector<32xf32> to vector<1x32xf32>
    %174 = vector.broadcast %173 : vector<1x32xf32> to vector<8x32xf32>
    %175 = arith.mulf %172, %174 : vector<8x32xf32>
    %176 = vector.shape_cast %154 : vector<32xf32> to vector<1x32xf32>
    %177 = vector.broadcast %176 : vector<1x32xf32> to vector<8x32xf32>
    %178 = arith.addf %175, %177 : vector<8x32xf32>
    %179 = arith.truncf %178 : vector<8x32xf32> to vector<8x32xbf16>
    %c0_102 = arith.constant 0 : index
    %c0_103 = arith.constant 0 : index
    %180 = vector.load %arg15[%c0_102, %c0_103] : memref<32x64xbf16, #tpu.memory_space<vmem>>, vector<32x64xbf16>
    %cst_104 = arith.constant dense<0.000000e+00> : vector<8x64xf32>
    %181 = tpu.matmul %179, %180, %cst_104 {dimension_numbers = #tpu.dot_dimension_numbers<[1], [0], [0], [1], [0, 0, 1, 1], [], []>} : vector<8x32xbf16>, vector<32x64xbf16>, vector<8x64xf32> -> vector<8x64xf32>
    %c0_105 = arith.constant 0 : index
    %c0_106 = arith.constant 0 : index
    %182 = vector.load %arg16[%c0_105, %c0_106] : memref<1x64xf32, #tpu.memory_space<vmem>>, vector<1x64xf32>
    %183 = vector.shape_cast %182 : vector<1x64xf32> to vector<64xf32>
    %184 = vector.shape_cast %183 : vector<64xf32> to vector<1x64xf32>
    %185 = vector.broadcast %184 : vector<1x64xf32> to vector<8x64xf32>
    %186 = arith.addf %181, %185 : vector<8x64xf32>
    %cst_107 = arith.constant 5.000000e-01 : f32
    %187 = vector.broadcast %cst_107 : f32 to vector<8x64xf32>
    %188 = arith.mulf %187, %186 : vector<8x64xf32>
    %cst_108 = arith.constant 0.707106769 : f32
    %189 = vector.broadcast %cst_108 : f32 to vector<8x64xf32>
    %190 = arith.mulf %186, %189 : vector<8x64xf32>
    %191 = math.erf %190 : vector<8x64xf32>
    %cst_109 = arith.constant 1.000000e+00 : f32
    %192 = vector.broadcast %cst_109 : f32 to vector<8x64xf32>
    %193 = arith.addf %192, %191 : vector<8x64xf32>
    %194 = arith.mulf %188, %193 : vector<8x64xf32>
    %195 = arith.truncf %194 : vector<8x64xf32> to vector<8x64xbf16>
    %c0_110 = arith.constant 0 : index
    %c0_111 = arith.constant 0 : index
    %196 = vector.load %arg17[%c0_110, %c0_111] : memref<64x32xbf16, #tpu.memory_space<vmem>>, vector<64x32xbf16>
    %cst_112 = arith.constant dense<0.000000e+00> : vector<8x32xf32>
    %197 = tpu.matmul %195, %196, %cst_112 {dimension_numbers = #tpu.dot_dimension_numbers<[1], [0], [0], [1], [0, 0, 1, 1], [], []>} : vector<8x64xbf16>, vector<64x32xbf16>, vector<8x32xf32> -> vector<8x32xf32>
    %c0_113 = arith.constant 0 : index
    %c0_114 = arith.constant 0 : index
    %198 = vector.load %arg18[%c0_113, %c0_114] : memref<1x32xf32, #tpu.memory_space<vmem>>, vector<1x32xf32>
    %199 = vector.shape_cast %198 : vector<1x32xf32> to vector<32xf32>
    %200 = vector.shape_cast %199 : vector<32xf32> to vector<1x32xf32>
    %201 = vector.broadcast %200 : vector<1x32xf32> to vector<8x32xf32>
    %202 = arith.addf %197, %201 : vector<8x32xf32>
    %203 = arith.addf %202, %178 : vector<8x32xf32>
    %c0_115 = arith.constant 0 : index
    %c0_116 = arith.constant 0 : index
    %204 = vector.load %arg19[%c0_115, %c0_116] : memref<1x32xf32, #tpu.memory_space<vmem>>, vector<1x32xf32>
    %205 = vector.shape_cast %204 : vector<1x32xf32> to vector<32xf32>
    %c0_117 = arith.constant 0 : index
    %c0_118 = arith.constant 0 : index
    %206 = vector.load %arg20[%c0_117, %c0_118] : memref<1x32xf32, #tpu.memory_space<vmem>>, vector<1x32xf32>
    %207 = vector.shape_cast %206 : vector<1x32xf32> to vector<32xf32>
    %cst_119 = arith.constant dense<0.000000e+00> : vector<8xf32>
    %208 = vector.multi_reduction <add>, %203, %cst_119 [1] : vector<8x32xf32> to vector<8xf32>
    %209 = vector.shape_cast %208 : vector<8xf32> to vector<8x1xf32>
    %cst_120 = arith.constant 3.200000e+01 : f32
    %210 = vector.broadcast %cst_120 : f32 to vector<8x1xf32>
    %211 = arith.divf %209, %210 : vector<8x1xf32>
    %212 = vector.broadcast %211 : vector<8x1xf32> to vector<8x32xf32>
    %213 = arith.subf %203, %212 : vector<8x32xf32>
    %214 = arith.mulf %213, %213 : vector<8x32xf32>
    %cst_121 = arith.constant dense<0.000000e+00> : vector<8xf32>
    %215 = vector.multi_reduction <add>, %214, %cst_121 [1] : vector<8x32xf32> to vector<8xf32>
    %216 = vector.shape_cast %215 : vector<8xf32> to vector<8x1xf32>
    %cst_122 = arith.constant 3.200000e+01 : f32
    %217 = vector.broadcast %cst_122 : f32 to vector<8x1xf32>
    %218 = arith.divf %216, %217 : vector<8x1xf32>
    %219 = vector.broadcast %211 : vector<8x1xf32> to vector<8x32xf32>
    %220 = arith.subf %203, %219 : vector<8x32xf32>
    %cst_123 = arith.constant 9.99999996E-13 : f32
    %221 = vector.broadcast %cst_123 : f32 to vector<8x1xf32>
    %222 = arith.addf %218, %221 : vector<8x1xf32>
    %223 = math.rsqrt %222 : vector<8x1xf32>
    %224 = vector.broadcast %223 : vector<8x1xf32> to vector<8x32xf32>
    %225 = arith.mulf %220, %224 : vector<8x32xf32>
    %226 = vector.shape_cast %205 : vector<32xf32> to vector<1x32xf32>
    %227 = vector.broadcast %226 : vector<1x32xf32> to vector<8x32xf32>
    %228 = arith.mulf %225, %227 : vector<8x32xf32>
    %229 = vector.shape_cast %207 : vector<32xf32> to vector<1x32xf32>
    %230 = vector.broadcast %229 : vector<1x32xf32> to vector<8x32xf32>
    %231 = arith.addf %228, %230 : vector<8x32xf32>
    %c0_124 = arith.constant 0 : index
    %c0_125 = arith.constant 0 : index
    %c0_126 = arith.constant 0 : index
    %232 = vector.load %arg21[%c0_124, %c0_125, %c0_126] : memref<1x8x32xf32, #tpu.memory_space<vmem>>, vector<1x8x32xf32>
    %233 = vector.shape_cast %232 : vector<1x8x32xf32> to vector<8x32xf32>
    %234 = vector.shape_cast %231 : vector<8x32xf32> to vector<1x8x32xf32>
    tpu.vector_store %arg21[%c0_124, %c0_125, %c0_126], %234 {strides = array<i32>} : memref<1x8x32xf32, #tpu.memory_space<vmem>>, vector<1x8x32xf32>,
    return
  }
  func.func @transform_0(%arg0: i32, %arg1: i32) -> (i32, i32, i32) {
    %c0_i32 = arith.constant 0 : i32
    %c0_i32_0 = arith.constant 0 : i32
    return %arg0, %arg1, %c0_i32 : i32, i32, i32
  }
  func.func @transform_1(%arg0: i32, %arg1: i32) -> (i32, i32, i32) {
    %c0_i32 = arith.constant 0 : i32
    %c0_i32_0 = arith.constant 0 : i32
    %c0_i32_1 = arith.constant 0 : i32
    return %arg0, %c0_i32, %c0_i32_0 : i32, i32, i32
  }
  func.func @transform_2(%arg0: i32, %arg1: i32) -> (i32, i32, i32) {
    %c0_i32 = arith.constant 0 : i32
    %c0_i32_0 = arith.constant 0 : i32
    %c0_i32_1 = arith.constant 0 : i32
    return %arg0, %c0_i32, %c0_i32_0 : i32, i32, i32
  }
  func.func @transform_3(%arg0: i32, %arg1: i32) -> (i32, i32, i32) {
    %c0_i32 = arith.constant 0 : i32
    %c0_i32_0 = arith.constant 0 : i32
    %c0_i32_1 = arith.constant 0 : i32
    %c0_i32_2 = arith.constant 0 : i32
    return %c0_i32, %c0_i32_0, %c0_i32_1 : i32, i32, i32
  }
  func.func @transform_4(%arg0: i32, %arg1: i32) -> (i32, i32, i32) {
    %c0_i32 = arith.constant 0 : i32
    %c0_i32_0 = arith.constant 0 : i32
    %c0_i32_1 = arith.constant 0 : i32
    %c0_i32_2 = arith.constant 0 : i32
    return %c0_i32, %c0_i32_0, %c0_i32_1 : i32, i32, i32
  }
  func.func @transform_5(%arg0: i32, %arg1: i32) -> (i32, i32, i32) {
    %c0_i32 = arith.constant 0 : i32
    %c0_i32_0 = arith.constant 0 : i32
    %c0_i32_1 = arith.constant 0 : i32
    %c0_i32_2 = arith.constant 0 : i32
    return %c0_i32, %c0_i32_0, %c0_i32_1 : i32, i32, i32
  }
  func.func @transform_6(%arg0: i32, %arg1: i32) -> (i32, i32, i32) {
    %c0_i32 = arith.constant 0 : i32
    %c0_i32_0 = arith.constant 0 : i32
    %c0_i32_1 = arith.constant 0 : i32
    %c0_i32_2 = arith.constant 0 : i32
    return %c0_i32, %c0_i32_0, %c0_i32_1 : i32, i32, i32
  }
  func.func @transform_7(%arg0: i32, %arg1: i32) -> (i32, i32, i32) {
    %c0_i32 = arith.constant 0 : i32
    %c0_i32_0 = arith.constant 0 : i32
    %c0_i32_1 = arith.constant 0 : i32
    %c0_i32_2 = arith.constant 0 : i32
    return %c0_i32, %c0_i32_0, %c0_i32_1 : i32, i32, i32
  }
  func.func @transform_8(%arg0: i32, %arg1: i32) -> (i32, i32, i32) {
    %c0_i32 = arith.constant 0 : i32
    %c0_i32_0 = arith.constant 0 : i32
    %c0_i32_1 = arith.constant 0 : i32
    %c0_i32_2 = arith.constant 0 : i32
    return %c0_i32, %c0_i32_0, %c0_i32_1 : i32, i32, i32
  }
  func.func @transform_9(%arg0: i32, %arg1: i32) -> (i32, i32, i32) {
    %c0_i32 = arith.constant 0 : i32
    %c0_i32_0 = arith.constant 0 : i32
    %c0_i32_1 = arith.constant 0 : i32
    %c0_i32_2 = arith.constant 0 : i32
    return %c0_i32, %c0_i32_0, %c0_i32_1 : i32, i32, i32
  }
  func.func @transform_10(%arg0: i32, %arg1: i32) -> (i32, i32) {
    %c0_i32 = arith.constant 0 : i32
    %c0_i32_0 = arith.constant 0 : i32
    %c0_i32_1 = arith.constant 0 : i32
    return %c0_i32, %c0_i32_0 : i32, i32
  }
  func.func @transform_11(%arg0: i32, %arg1: i32) -> (i32, i32) {
    %c0_i32 = arith.constant 0 : i32
    %c0_i32_0 = arith.constant 0 : i32
    %c0_i32_1 = arith.constant 0 : i32
    return %c0_i32, %c0_i32_0 : i32, i32
  }
  func.func @transform_12(%arg0: i32, %arg1: i32) -> (i32, i32) {
    %c0_i32 = arith.constant 0 : i32
    %c0_i32_0 = arith.constant 0 : i32
    %c0_i32_1 = arith.constant 0 : i32
    return %c0_i32, %c0_i32_0 : i32, i32
  }
  func.func @transform_13(%arg0: i32, %arg1: i32) -> (i32, i32) {
    %c0_i32 = arith.constant 0 : i32
    %c0_i32_0 = arith.constant 0 : i32
    %c0_i32_1 = arith.constant 0 : i32
    return %c0_i32, %c0_i32_0 : i32, i32
  }
  func.func @transform_14(%arg0: i32, %arg1: i32) -> (i32, i32) {
    %c0_i32 = arith.constant 0 : i32
    %c0_i32_0 = arith.constant 0 : i32
    %c0_i32_1 = arith.constant 0 : i32
    return %c0_i32, %c0_i32_0 : i32, i32
  }
  func.func @transform_15(%arg0: i32, %arg1: i32) -> (i32, i32) {
    %c0_i32 = arith.constant 0 : i32
    %c0_i32_0 = arith.constant 0 : i32
    %c0_i32_1 = arith.constant 0 : i32
    return %c0_i32, %c0_i32_0 : i32, i32
  }
  func.func @transform_16(%arg0: i32, %arg1: i32) -> (i32, i32) {
    %c0_i32 = arith.constant 0 : i32
    %c0_i32_0 = arith.constant 0 : i32
    %c0_i32_1 = arith.constant 0 : i32
    return %c0_i32, %c0_i32_0 : i32, i32
  }
  func.func @transform_17(%arg0: i32, %arg1: i32) -> (i32, i32) {
    %c0_i32 = arith.constant 0 : i32
    %c0_i32_0 = arith.constant 0 : i32
    %c0_i32_1 = arith.constant 0 : i32
    return %c0_i32, %c0_i32_0 : i32, i32
  }
  func.func @transform_18(%arg0: i32, %arg1: i32) -> (i32, i32) {
    %c0_i32 = arith.constant 0 : i32
    %c0_i32_0 = arith.constant 0 : i32
    %c0_i32_1 = arith.constant 0 : i32
    return %c0_i32, %c0_i32_0 : i32, i32
  }
  func.func @transform_19(%arg0: i32, %arg1: i32) -> (i32, i32, i32) {
    %c0_i32 = arith.constant 0 : i32
    %c0_i32_0 = arith.constant 0 : i32
    return %arg0, %arg1, %c0_i32 : i32, i32, i32
  }
}

</mosaic_0001>

<bundles_post_ra>
// kernel: tpu_custom_call.1
= control target key start
LH: loop header
LB: loop body
LE: loop exit
PB: predicated region body
PF: predicated region fallthrough
CT: control target
= control target key end

     0   :  { %s3584_s0 = inlined_call_operand.vmem [shape: f32[2,8,32], index: 0, kind: input, shape index: {}]   ;;  %s3585_s1 = inlined_call_operand.vmem [shape: f32[2,8,32], index: 1, kind: input, shape index: {}]   ;;  %s3586_s2 = inlined_call_operand.vmem [shape: f32[2,1,8], index: 2, kind: input, shape index: {}]   ;;  %s3587_s3 = inlined_call_operand.vmem [shape: bf16[4,32,8], index: 3, kind: input, shape index: {}]   ;;  %s3588_s4 = inlined_call_operand.vmem [shape: f32[4,1,8], index: 4, kind: input, shape index: {}]   ;;  %s3589_s5 = inlined_call_operand.vmem [shape: bf16[4,32,8], index: 5, kind: input, shape index: {}]   ;;  %s3590_s6 = inlined_call_operand.vmem [shape: f32[4,1,8], index: 6, kind: input, shape index: {}]   ;;  %s3591_s7 = inlined_call_operand.vmem [shape: bf16[4,32,8], index: 7, kind: input, shape index: {}]   ;;  %s3592_s8 = inlined_call_operand.vmem [shape: f32[4,1,8], index: 8, kind: input, shape index: {}]   ;;  %s3593_s9 = inlined_call_operand.vmem [shape: bf16[4,8,32], index: 9, kind: input, shape index: {}]   ;;  %s3594_s10 = inlined_call_operand.vmem [shape: f32[1,32], index: 10, kind: input, shape index: {}]   ;;  %s3595_s11 = inlined_call_operand.vmem [shape: f32[1,32], index: 11, kind: input, shape index: {}]   ;;  %s3596_s12 = inlined_call_operand.vmem [shape: f32[1,32], index: 12, kind: input, shape index: {}]   ;;  %s3597_s13 = inlined_call_operand.vmem [shape: bf16[32,64], index: 13, kind: input, shape index: {}]   ;;  %s3598_s14 = inlined_call_operand.vmem [shape: f32[1,64], index: 14, kind: input, shape index: {}]   ;;  %s3599_s15 = inlined_call_operand.vmem [shape: bf16[64,32], index: 15, kind: input, shape index: {}]   ;;  %s3600_s16 = inlined_call_operand.vmem [shape: f32[1,32], index: 16, kind: input, shape index: {}]   ;;  %s3601_s17 = inlined_call_operand.vmem [shape: f32[1,32], index: 17, kind: input, shape index: {}]   ;;  %s3602_s18 = inlined_call_operand.vmem [shape: f32[1,32], index: 18, kind: input, shape index: {}]   ;;  %s3603_s19 = inlined_call_operand.hbm [shape: f32[2,8,32], index: 19, kind: output, shape index: {}]  }
   0x1   :  { %3609 = sst [smem:[#allocation12_spill]] %s3584_s0 }
   0x2   :  { %3610 = sst [smem:[#allocation13_spill]] %s3585_s1 }
   0x3   :  { %3611 = sst [smem:[#allocation14_spill]] %s3586_s2 }
   0x4   :  { %3612 = sst [smem:[#allocation15_spill]] %s3587_s3 }
   0x5   :  { %3613 = sst [smem:[#allocation16_spill]] %s3588_s4 }
   0x6   :  { %3614 = sst [smem:[#allocation17_spill]] %s3589_s5 }
   0x7   :  { %3615 = sst [smem:[#allocation18_spill]] %s3590_s6 }
   0x8   :  { %3616 = sst [smem:[#allocation19_spill]] %s3591_s7 }
   0x9   :  { %24 = vsyncpa [#allocation5], 0 }
   0xa   :  { %26 = vsyncpa [#allocation5 + $0x1], 0  ;;  %s3127_s0 = smov 0   ;;  %s3129_s30 = smov 0  }
   0xb   :  { %s3131_s20 = smov 0   ;;  %s3133_s21 = smov 0  }
   0xc   :  { %s3135_s1 = smov 0   ;;  %s3137_s22 = smov 0  }
   0xd LB: > { %3617 = sst [smem:[#allocation7_spill]] %s3010_s20  ;;  %s2445_s2 = sadd.s32 4294967295, %s3022_s22   ;;  %s3022_s22 = sphi %s3137_s22, %s32_s22   ;;  %s3018_s1 = sphi %s3135_s1, %s3636_s1   ;;  %s3014_s21 = sphi %s3133_s21, %s3635_s21   ;;  %s3010_s20 = sphi %s3131_s20, %s3634_s20   ;;  %s3006_s30 = sphi %s3129_s30, %s3638_s30   ;;  %s3002_s0 = sphi %s3127_s0, %s3637_s0  }
   0xe   : > { %3618 = sst [smem:[#allocation8_spill]] %s3018_s1  ;;  %s2446_s23 = sadd.s32 4294967294, %s3022_s22  }
   0xf   : > { %s44_s24 = sadd.s32 1, %s3018_s1  ;;  %s469_s25 = sadd.s32 1, %s3010_s20 }
  0x10   : > { %p46_p0 = scmp.ge.s32.totalorder %s44_s24, 2  ;;  %p479_p1 = scmp.ne.s32.totalorder %s3010_s20, %s3006_s30 }
  0x11   : > { %p480_p2 = scmp.eq.s32.totalorder %s2445_s2, 1  ;;  %p485_p3 = scmp.ne.s32.totalorder %s3006_s30, %s3002_s0 }
  0x12   : > { %s3640_s24 = smov (%p46_p0, %s44_s24), 0  ;;  %p486_p5 = scmp.eq.s32.totalorder %s2446_s23, 1 }
  0x13   : > { %3619 = sst [smem:[#allocation9_spill]] %s3640_s24  ;;  %p3167_p4 = por %p480_p2, %p479_p1 }
  0x14   : > { %s464_s26 = ssub.s32 %s3018_s1, %s3640_s24  ;;  %p2449_p6 = scmp.ge.s32.totalorder %s3022_s22, 1 }
  0x15   : > { %p467_p7 = scmp.eq.s32.totalorder %s464_s26, 0  ;;  %p3174_p8 = por %p486_p5, %p485_p3 }
  0x16   : > { %p575_p9 = scmp.lt.s32.totalorder %s3022_s22, 3 }
  0x17   : > { %s3621_s27 = scalar_select %p3174_p8, 1, 0 }
  0x18   : > { %s3180_s28 = scalar_select %p467_p7, %s3010_s20, %s469_s25  }
  0x19   : > { %3622 = sst [smem:[#allocation10_spill]] %s3621_s27  ;;  %p576_p10 = pnand %p2449_p6, %p575_p9 }
  0x1a   : > { %3623 = sst [smem:[#allocation11_spill]] %s3180_s28  ;;  %p640_p11 = scmp.lt.s32.totalorder (!%p576_p10), %s3014_s21, 1 }
  0x1b   : > { %579 = sbr.rel (%p576_p10) target bundleno = 4364 (0x110c), region = 96  ;;  %s3624_s5 = sld [smem:[#allocation17_spill]] (!%p576_p10) }
  0x1c   : > { %s3625_s26 = sld [smem:[#allocation13_spill]] (!%p576_p10)  ;;  %s637_s23 = sand.u32 (!%p576_p10), 1, %s3006_s30  }
  0x1d   : > { %s3626_s7 = sld [smem:[#allocation19_spill]] (!%p576_p10)  ;;  %s3026_s1 = smov (!%p576_p10), [#allocation4]  }
  0x1e   : > { %s3627_s28 = sld [smem:[#allocation15_spill]] (!%p576_p10) }
  0x1f   : > { %s3629_s6 = sld [smem:[#allocation18_spill]] (!%p576_p10) }
  0x20   : > { %v3024_v1 = vmov 0.0   ;;  %vm3025_vm0 = vmmov 0   ;;  %s3197_s25 = scalar_select %p640_p11, %s3014_s21, 1  ;;  %vm684_vm1 = vcmask 261120   ;;  %vm792_vm2 = vcmask 60416  }
  0x21   : > { %v2894_v0 = vld [vmem:[%s3624_s5 + $0x8] sm:$0xff]   ;;  %2649 = vmatprep.subr.bf16.mxu0 %v3024_v1  ;;  %2657 = vmatprep.subr.bf16.mxu1 %v3024_v1  ;;  %v2895_v2 = vld [vmem:[%s3624_s5] sm:$0xff]   ;;  %v2896_v4 = vld [vmem:[%s3624_s5 + $0x18] sm:$0xff]   ;;  %vm1283_vm3 = vcmask 64512   ;;  %vm1346_vm4 = vcmask 1043456   ;;  %s3630_s4 = sld [smem:[#allocation16_spill]] }
  0x22   : > { %2650 = vmatpush3.bf16.msra.mxu0 %v2894_v0  ;;  %2653 = vmatprep.mubr.msk.bf16.mxu0 %vm3025_vm0, %v3024_v1  ;;  %s2451_s29 = sshll.u32 %s3197_s25, 3  ;;  %v2897_v7 = vld [vmem:[%s3624_s5 + $0x10] sm:$0xff]   ;;  %v2898_v9 = vld [vmem:[%s3624_s5 + $0x28] sm:$0xff]   ;;  %v2899_v11 = vld [vmem:[%s3624_s5 + $0x20] sm:$0xff]   ;;  %vm2263_vm5 = vcmask 523264  }
  0x23   : > { %2651 = vmatprep.subr.bf16.mxu0 %v3024_v1  ;;  %2661 = vmatprep.mubr.msk.bf16.mxu1 %vm3025_vm0, %v3024_v1  ;;  %s650_s24 = scalar_lea.vmem %s3625_s26, %s2451_s29  ;;  %v2904_v6 = vld [vmem:[%s3626_s7 + $0x8] sm:$0xff]   ;;  %v2905_v8 = vld [vmem:[%s3626_s7] sm:$0xff]   ;;  %v2906_v10 = vld [vmem:[%s3626_s7 + $0x18] sm:$0xff]   ;;  %s3628_s26 = sld [smem:[#allocation12_spill]] }
  0x24   : > { %v659_v3 = vld [vmem:[%s650_s24] sm:$0xff]  ;;  %2658 = vmatpush3.bf16.msra.mxu1 %v2904_v6  ;;  %v2907_v12 = vld [vmem:[%s3626_s7 + $0x10] sm:$0xff]   ;;  %v2900_v13 = vld [vmem:[%s3624_s5 + $0x38] sm:$0xff]   ;;  %s3631_s24 = sld [smem:[#allocation14_spill]] }
  0x25   : > { %v3209_v5 = vpack.c.bf16 %v659_v3, %v659_v3  ;;  %2659 = vmatprep.subr.bf16.mxu1 %v3024_v1  ;;  %v2908_v14 = vld [vmem:[%s3626_s7 + $0x28] sm:$0xff]   ;;  %v2901_v15 = vld [vmem:[%s3624_s5 + $0x30] sm:$0xff]   ;;  %v2903_v17 = vld [vmem:[%s3627_s28] sm:$0xff]   ;;  %s2450_s5 = sshll.u32 %s637_s23, 3 }
  0x26   : > { %2652 = vmatpush3.bf16.msra.mxu0 %v2895_v2  ;;  %v2902_v16 = vld [vmem:[%s3627_s28 + $0x8] sm:$0xff]   ;;  %v2909_v20 = vld [vmem:[%s3626_s7 + $0x20] sm:$0xff]   ;;  %v2910_v21 = vld [vmem:[%s3626_s7 + $0x38] sm:$0xff]   ;;  %s639_s27 = scalar_lea.vmem [#allocation4], %s2450_s5 }
  0x27   : > { %2665 = vmatprep.subr.bf16.mxu0 %v3024_v1  ;;  %v2911_v22 = vld [vmem:[%s3626_s7 + $0x30] sm:$0xff]   ;;  %v2453_v23 = vld [vmem:[%s3629_s6] ss:$0 sm:$0xff]  ;;  %v2466_v30 = vld [vmem:[%s3629_s6 + $0x1] ss:$0 sm:$0xff]  ;;  %s2339_s7 = scalar_lea.sflag [#allocation5], %s637_s23 }
  0x28   : > { %2660 = vmatpush3.bf16.msra.mxu1 %v2905_v8  ;;  %v2457_v32 = vld [vmem:[%s3592_s8] ss:$0 sm:$0xff]  ;;  %v2484_v44 = vld [vmem:[%s3629_s6 + $0x2] ss:$0 sm:$0xff]  ;;  %v2475_v48 = vld [vmem:[%s3592_s8 + $0x1] ss:$0 sm:$0xff] }
  0x29   : > { %2654 = vmatmul.mubr.msk.bf16.vlgmr.msra.gmra.mxu0 %vm684_vm1, %v3209_v5  ;;  %2673 = vmatprep.subr.bf16.mxu1 %v3024_v1  ;;  %s646_s2 = scalar_lea.vmem %s3628_s26, %s2451_s29  ;;  %v2502_v58 = vld [vmem:[%s3629_s6 + $0x3] ss:$0 sm:$0xff]  ;;  %v2515_v6 = vld [vmem:[%s3630_s4] ss:$0 sm:$0xff]  ;;  %s2353_s26 = sshll.u32 %s639_s27, 4  ;;  %s2354_s26 = int_to_ptr.vmem [resolvable:$true] %s2353_s26 }
  0x2a   : > { %2666 = vmatpush3.bf16.msra.mxu0 %v2896_v4  ;;  %2669 = vmatprep.mubr.msk.bf16.mxu0 %vm3025_vm0, %v3024_v1  ;;  %v3287_v18 = vld [vmem:[%s646_s2] sm:$0xff]  ;;  %s653_s20 = scalar_lea.vmem %s3631_s24, %s3197_s25  ;;  %s2578_s25 = sshll.u32 %s3014_s21, 7 }
  0x2b   : > { %2667 = vmatprep.subr.bf16.mxu0 %v3024_v1  ;;  %2662 = vmatmul.mubr.msk.bf16.vlgmr.msra.gmra.mxu1 %vm684_vm1, %v3209_v5  ;;  %v3292_v19 = vpack.c.bf16 %v3287_v18, %v3287_v18  ;;  %s2351_s6 = scalar_lea.hbm %s3603_s19, %s2578_s25  ;;  %s2946_s29 = scalar_lea.vmem %s2354_s26, 128 }
  0x2c   : > { %2674 = vmatpush3.bf16.msra.mxu1 %v2906_v10  ;;  %2677 = vmatprep.mubr.msk.bf16.mxu1 %vm3025_vm0, %v3024_v1  ;;  %p2947_p12 = scmp.ne.s32.totalorder %s2354_s26, %s2946_s29  ;;  %s2950_s24 = sshll.u32 %s3026_s1, 4  ;;  %s2951_s24 = int_to_ptr.vmem [resolvable:$false] %s2950_s24 }
  0x2d   : > { %2675 = vmatprep.subr.bf16.mxu1 %v3024_v1  ;;  %s2952_s21 = scalar_lea.vmem %s2951_s24, 256  ;;  %p2953_p1 = scmp.lt.s32.totalorder %s2354_s26, %s2951_s24 }
  0x2e   : > { %2668 = vmatpush3.bf16.msra.mxu0 %v2897_v7  ;;  %p2948_p13 = pnand %p2947_p12, %p3167_p4  ;;  %p2954_p2 = scmp.lt.s32.totalorder %s2952_s21, %s2946_s29 }
  0x2f   : > { %2681 = vmatprep.subr.bf16.mxu0 %v3024_v1 }
  0x30   : > { %2676 = vmatpush3.bf16.msra.mxu1 %v2907_v12  ;;  %v2912_v12 = vld [vmem:[%s3627_s28 + $0x18] sm:$0xff]   ;;  %p2949_p0 = pneg %p2948_p13  ;;  %p2955_p3 = por %p2954_p2, %p2953_p1 }
  0x31   : > { %2670 = vmatmul.mubr.msk.bf16.vlgmr.msra.gmra.mxu0 %vm684_vm1, %v3209_v5  ;;  %2689 = vmatprep.subr.bf16.mxu1 %v3024_v1 }
  0x32   : > { %2682 = vmatpush3.bf16.msra.mxu0 %v2898_v9  ;;  %2685 = vmatprep.mubr.msk.bf16.mxu0 %vm3025_vm0, %v3024_v1  ;;  %p2956_p5 = pnand %p2955_p3, %p2949_p0 }
  0x33   : > { %2683 = vmatprep.subr.bf16.mxu0 %v3024_v1  ;;  %2678 = vmatmul.mubr.msk.bf16.vlgmr.msra.gmra.mxu1 %vm684_vm1, %v3209_v5 }
  0x34   : > { %2690 = vmatpush3.bf16.msra.mxu1 %v2908_v14  ;;  %2693 = vmatprep.mubr.msk.bf16.mxu1 %vm3025_vm0, %v3024_v1 }
  0x35   : > { %2691 = vmatprep.subr.bf16.mxu1 %v3024_v1 }
  0x36   : > { %2684 = vmatpush3.bf16.msra.mxu0 %v2899_v11 }
  0x37   : > { %2697 = vmatprep.subr.bf16.mxu0 %v3024_v1 }
  0x38   : > { %2692 = vmatpush3.bf16.msra.mxu1 %v2909_v20  ;;  %v2493_v20 = vld [vmem:[%s3592_s8 + $0x2] ss:$0 sm:$0xff] }
  0x39   : > { %2686 = vmatmul.mubr.msk.bf16.vlgmr.msra.gmra.mxu0 %vm684_vm1, %v3209_v5  ;;  %2705 = vmatprep.subr.bf16.mxu1 %v3024_v1 }
  0x3a   : > { %2698 = vmatpush3.bf16.msra.mxu0 %v2900_v13  ;;  %2701 = vmatprep.mubr.msk.bf16.mxu0 %vm3025_vm0, %v3024_v1 }
  0x3b   : > { %2699 = vmatprep.subr.bf16.mxu0 %v3024_v1  ;;  %2694 = vmatmul.mubr.msk.bf16.vlgmr.msra.gmra.mxu1 %vm684_vm1, %v3209_v5 }
  0x3c   : > { %2706 = vmatpush3.bf16.msra.mxu1 %v2910_v21  ;;  %2709 = vmatprep.mubr.msk.bf16.mxu1 %vm3025_vm0, %v3024_v1 }
  0x3d   : > { %2707 = vmatprep.subr.bf16.mxu1 %v3024_v1 }
  0x3e   : > { %2700 = vmatpush3.bf16.msra.mxu0 %v2901_v15  ;;  %v2913_v15 = vld [vmem:[%s3627_s28 + $0x10] sm:$0xff]  }
  0x3f   : > { %2713 = vmatprep.subr.bf16.mxu0 %v3024_v1 }
  0x40   : > { %2708 = vmatpush3.bf16.msra.mxu1 %v2911_v22 }
  0x41   : > { %2702 = vmatmul.mubr.msk.bf16.vlgmr.msra.gmra.mxu0 %vm684_vm1, %v3209_v5  ;;  %2721 = vmatprep.subr.bf16.mxu1 %v3024_v1 }
  0x42   : > { %2714 = vmatpush3.bf16.msra.mxu0 %v2902_v16  ;;  %2717 = vmatprep.mubr.msk.bf16.mxu0 %vm3025_vm0, %v3024_v1 }
  0x43   : > { %2715 = vmatprep.subr.bf16.mxu0 %v3024_v1  ;;  %2710 = vmatmul.mubr.msk.bf16.vlgmr.msra.gmra.mxu1 %vm684_vm1, %v3209_v5 }
  0x44   : > { %2723 = vmatprep.mubr.msk.bf16.mxu1 %vm3025_vm0, %v3024_v1 }
  0x46   : > { %2716 = vmatpush3.bf16.msra.mxu0 %v2903_v17 }
  0x47   : > { %2727 = vmatprep.subr.bf16.mxu0 %v3024_v1 }
  0x49   : > { %2718 = vmatmul.mubr.msk.bf16.vlgmr.msra.gmra.mxu0 %vm684_vm1, %v3292_v19 }
  0x4a   : > { %2729 = vmatprep.mubr.msk.bf16.mxu0 %vm3025_vm0, %v3024_v1 }
  0xe9   : > { %v722_v24 = vpop.f32.mrf.mxu0 }
  0xea   : > { %v723_v25 = vadd.f32 %v2453_v23, %v722_v24 }
  0xeb   : > { %v2655_v26 = vpop.f32.mrf.mxu0  ;;  %v785_v35 = vpop.f32.mrf.mxu1 }
  0xec   : > { %v791_v27 = vpack.c.bf16 %v723_v25, %v723_v25  ;;  %v786_v37 = vadd.f32 %v2457_v32, %v785_v35 }
  0xed   : > { %v725_v28 = vpop.f32.mrf.mxu0  ;;  %v2663_v40 = vpop.f32.mrf.mxu1 }
  0xee   : > { %793 = vst.msk [vmem:[#allocation2] sm:$0xf] %vm792_vm2, %v791_v27  ;;  %v794_v42 = vpack.c.bf16 %v786_v37, %v786_v37  ;;  %v2511_v27 = vld [vmem:[%s3592_s8 + $0x3] ss:$0 sm:$0xff] }
  0xef   : > { %v2656_v29 = vpop.f32.mrf.mxu0  ;;  %v788_v45 = vpop.f32.mrf.mxu1 }
  0xf0   : > { %795 = vst.msk [vmem:[#allocation3] sm:$0xf] %vm792_vm2, %v794_v42 }
  0xf1   : > { %v855_v31 = vpop.f32.mrf.mxu0  ;;  %v2664_v47 = vpop.f32.mrf.mxu1 }
  0xf2   : > { %v856_v33 = vadd.f32 %v2466_v30, %v855_v31 }
  0xf3   : > { %v2671_v34 = vpop.f32.mrf.mxu0  ;;  %v920_v51 = vpop.f32.mrf.mxu1 }
  0xf4   : > { %v926_v36 = vpack.c.bf16 %v856_v33, %v856_v33  ;;  %v921_v53 = vadd.f32 %v2475_v48, %v920_v51  ;;  %v3379_v34 = vld [vmem:[%s653_s20] ss:$0 sm:$0xff]  ;;  %v2527_v51 = vld [vmem:[%s3630_s4 + $0x1] ss:$0 sm:$0xff] }
  0xf5   : > { %v858_v38 = vpop.f32.mrf.mxu0  ;;  %v1276_v39 = vld [vmem:[#allocation2] sm:$0xf]  ;;  %v2679_v55 = vpop.f32.mrf.mxu1 }
  0xf6   : > { %928 = vst.msk [vmem:[#allocation2 + $0x4] sm:$0xf] %vm792_vm2, %v926_v36  ;;  %v1288_v41 = vsel %vm1283_vm3, %v1276_v39, 0  ;;  %v929_v56 = vpack.c.bf16 %v921_v53, %v921_v53 }
  0xf7   : > { %v2672_v43 = vpop.f32.mrf.mxu0  ;;  %2722 = vmatpush3.bf16.xpose.msra.mxu1 %v1288_v41  ;;  %v923_v59 = vpop.f32.mrf.mxu1  ;;  %v1342_v60 = vld [vmem:[#allocation3] sm:$0xf] }
  0xf8   : > { %2733 = vmatprep.subr.bf16.mxu1 %v3024_v1  ;;  %931 = vst.msk [vmem:[#allocation3 + $0x4] sm:$0xf] %vm792_vm2, %v929_v56  ;;  %v1348_v61 = vsel %vm1346_vm4, %v1342_v60, 0 }
  0xf9   : > { %v991_v46 = vpop.f32.mrf.mxu0  ;;  %v2680_v63 = vpop.f32.mrf.mxu1  ;;  %2728 = vmatpush3.bf16.msra.mxu0 %v1348_v61 }
  0xfa   : > { %v992_v49 = vadd.f32 %v2484_v44, %v991_v46  ;;  %2741 = vmatprep.subr.bf16.mxu0 %v3024_v1 }
  0xfb   : > { %v2687_v50 = vpop.f32.mrf.mxu0  ;;  %v1056_v21 = vpop.f32.mrf.mxu1 }
  0xfc   : > { %v1062_v52 = vpack.c.bf16 %v992_v49, %v992_v49  ;;  %v1057_v22 = vadd.f32 %v2493_v20, %v1056_v21 }
  0xfd   : > { %v994_v54 = vpop.f32.mrf.mxu0  ;;  %v2695_v23 = vpop.f32.mrf.mxu1  ;;  %v1460_v55 = vld [vmem:[#allocation2 + $0x4] sm:$0xf] }
  0xfe   : > { %1064 = vst.msk [vmem:[#allocation2 + $0x8] sm:$0xf] %vm792_vm2, %v1062_v52  ;;  %v1065_v24 = vpack.c.bf16 %v1057_v22, %v1057_v22 }
  0xff   : > { %v2688_v57 = vpop.f32.mrf.mxu0  ;;  %v1520_v16 = vld [vmem:[#allocation3 + $0x4] sm:$0xf]  ;;  %v1059_v25 = vpop.f32.mrf.mxu1 }
 0x100   : > { %v1525_v17 = vsel %vm1346_vm4, %v1520_v16, 0  ;;  %1067 = vst.msk [vmem:[#allocation3 + $0x8] sm:$0xf] %vm792_vm2, %v1065_v24  ;;  %v1391_v16 = vld [vmem:[%s3593_s9] sm:$0xf] }
 0x101   : > { %v1127_v62 = vpop.f32.mrf.mxu0  ;;  %v2696_v26 = vpop.f32.mrf.mxu1  ;;  %v1620_v21 = vsel %vm1346_vm4, %v1391_v16, 0 }
 0x102   : > { %v1128_v0 = vadd.f32 %v2502_v58, %v1127_v62  ;;  %v1465_v58 = vsel %vm1283_vm3, %v1460_v55, 0  ;;  %v2914_v26 = vld [vmem:[%s3627_s28 + $0x28] sm:$0xff]  }
 0x103   : > { %v2703_v2 = vpop.f32.mrf.mxu0  ;;  %v1192_v28 = vpop.f32.mrf.mxu1 }
 0x104   : > { %v1198_v3 = vpack.c.bf16 %v1128_v0, %v1128_v0  ;;  %v1193_v29 = vadd.f32 %v2511_v27, %v1192_v28 }
 0x105   : > { %v1130_v4 = vpop.f32.mrf.mxu0  ;;  %v2711_v30 = vpop.f32.mrf.mxu1  ;;  %v1730_v22 = vld [vmem:[#allocation2 + $0x8] sm:$0xf] }
 0x106   : > { %1200 = vst.msk [vmem:[#allocation2 + $0xc] sm:$0xf] %vm792_vm2, %v1198_v3  ;;  %v1201_v31 = vpack.c.bf16 %v1193_v29, %v1193_v29  ;;  %v1735_v24 = vsel %vm1283_vm3, %v1730_v22, 0  ;;  %v2915_v30 = vld [vmem:[%s3627_s28 + $0x20] sm:$0xff]  }
 0x107   : > { %v2704_v5 = vpop.f32.mrf.mxu0  ;;  %v1195_v32 = vpop.f32.mrf.mxu1 }
 0x108   : > { %1203 = vst.msk [vmem:[#allocation3 + $0xc] sm:$0xf] %vm792_vm2, %v1201_v31 }
 0x109   : > { %v1268_v7 = vpop.f32.mrf.mxu0  ;;  %v2712_v33 = vpop.f32.mrf.mxu1 }
 0x10a   : > { %v1269_v8 = vadd.f32 %v2515_v6, %v1268_v7  ;;  %v1790_v33 = vld [vmem:[#allocation3 + $0x8] sm:$0xf] }
 0x10b   : > { %v2719_v9 = vpop.f32.mrf.mxu0 }
 0x10c   : > { %v1274_v10 = vmul.f32 0.35355338, %v1269_v8 }
 0x10d   : > { %v1271_v11 = vpop.f32.mrf.mxu0 }
 0x10e   : > { %v1275_v13 = vpack.c.bf16 %v1274_v10, %v1274_v10 }
 0x10f   : > { %v2720_v14 = vpop.f32.mrf.mxu0 }
 0x110   : > { %2724 = vmatmul.mubr.msk.bf16.vlgmr.msra.gmra.mxu1 %vm1283_vm3, %v1275_v13 }
 0x111   : > { %2734 = vmatpush3.bf16.msra.mxu1 %v2912_v12  ;;  %2737 = vmatprep.mubr.msk.bf16.mxu1 %vm3025_vm0, %v3024_v1  ;;  %v2533_v12 = vld [vmem:[%s3593_s9 + $0x4] sm:$0xf] }
 0x112   : > { %2735 = vmatprep.subr.bf16.mxu1 %v3024_v1  ;;  %v1574_v13 = vsel %vm1346_vm4, %v2533_v12, 0 }
 0x115   : > { %2736 = vmatpush3.bf16.msra.mxu1 %v2913_v15 }
 0x116   : > { %2747 = vmatprep.subr.bf16.mxu1 %v3024_v1 }
 0x118   : > { %2738 = vmatmul.mubr.msk.bf16.vlgmr.msra.gmra.mxu1 %vm684_vm1, %v3292_v19 }
 0x119   : > { %2748 = vmatpush3.bf16.msra.mxu1 %v1525_v17  ;;  %2749 = vmatprep.mubr.msk.bf16.mxu1 %vm3025_vm0, %v3024_v1 }
 0x11a   : > { %2759 = vmatprep.subr.bf16.mxu1 %v3024_v1 }
 0x1d0   : > { %v1324_v35 = vpop.f32.mrf.mxu1 }
 0x1d1   : > { %v1325_v36 = vadd.f32 %v3379_v34, %v1324_v35 }
 0x1d2   : > { %v2725_v37 = vpop.f32.mrf.mxu1 }
 0x1d3   : > { %v1330_v38 = vsel %vm1283_vm3, %v1325_v36, -inf }
 0x1d4   : > { %1331 = vmax.xlane.f32.xlu0 %v1330_v38  ;;  %v1327_v39 = vpop.f32.mrf.mxu1 }
 0x1d6   : > { %v2726_v40 = vpop.f32.mrf.mxu1 }
 0x1d8   : > { %v1451_v46 = vpop.f32.mrf.mxu1 }
 0x1d9   : > { %v1452_v53 = vadd.f32 %v2527_v51, %v1451_v46 }
 0x1da   : > { %v2739_v47 = vpop.f32.mrf.mxu1 }
 0x1db   : > { %v1457_v57 = vmul.f32 0.35355338, %v1452_v53 }
 0x1dc   : > { %v1454_v48 = vpop.f32.mrf.mxu1 }
 0x1dd   : > { %v1458_v59 = vpack.c.bf16 %v1457_v57, %v1457_v57 }
 0x1de   : > { %v2740_v49 = vpop.f32.mrf.mxu1 }
 0x25d   : > { %v1332_v41 = vpop.xlane.xlu0 %1331 }
 0x25e   : > { %v1333_v42 = vsub.f32 %v1325_v36, %v1332_v41  ;;  %v1795_v36 = vsel %vm1346_vm4, %v1790_v33, 0 }
 0x260   : > { %v1334_v43 = vmul.f32 1.442695, %v1333_v42 }
 0x262   : > { %2924 = vpow2.f32 %v1334_v43  ;;  %v2541_v43 = vld [vmem:[%s3630_s4 + $0x2] ss:$0 sm:$0xff] }
 0x26f   : > { %v2925_v44 = vpop.eup %2924 }
 0x270   : > { %v1336_v45 = vsel %vm1283_vm3, %v2925_v44, 0.0 }
 0x271   : > { %1337 = vadd.xlane.f32.xlu0 %v1336_v45 }
 0x2fa   : > { %v1338_v50 = vpop.xlane.xlu0 %1337 }
 0x2fb   : > { %2926 = vrcp.f32 %v1338_v50 }
 0x308   : > { %v2927_v52 = vpop.eup %2926 }
 0x309   : > { %v1340_v54 = vmul.f32 %v2927_v52, %v2925_v44 }
 0x30b   : > { %v1341_v56 = vpack.c.bf16 %v1340_v54, %v1340_v54 }
 0x30d   : > { %2730 = vmatmul.mubr.msk.bf16.vlgmr.msra.gmra.mxu0 %vm1283_vm3, %v1341_v56 }
 0x30e   : > { %2742 = vmatpush3.bf16.xpose.msra.mxu0 %v1465_v58  ;;  %2743 = vmatprep.mubr.msk.bf16.mxu0 %vm3025_vm0, %v3024_v1 }
 0x30f   : > { %2753 = vmatprep.subr.bf16.mxu0 %v3024_v1 }
 0x315   : > { %2744 = vmatmul.mubr.msk.bf16.vlgmr.msra.gmra.mxu0 %vm1283_vm3, %v1458_v59 }
 0x316   : > { %2755 = vmatprep.mubr.msk.bf16.mxu0 %vm3025_vm0, %v3024_v1  ;;  %2754 = vmatpush3.bf16.msra.mxu0 %v1574_v13 }
 0x317   : > { %2765 = vmatprep.subr.bf16.mxu0 %v3024_v1 }
 0x3cd   : > { %v1384_v60 = vpop.f32.mrf.mxu0 }
 0x3ce   : > { %v1390_v23 = vpack.c.bf16 %v1384_v60, %v1384_v60 }
 0x3cf   : > { %v2731_v61 = vpop.f32.mrf.mxu0 }
 0x3d1   : > { %v1387_v62 = vpop.f32.mrf.mxu0 }
 0x3d2   : > { %v2547_v62 = vld [vmem:[%s3593_s9 + $0x8] sm:$0xf] }
 0x3d3   : > { %v2732_v63 = vpop.f32.mrf.mxu0 }
 0x3d4   : > { %v1844_v63 = vsel %vm1346_vm4, %v2547_v62, 0 }
 0x3d5   : > { %v1501_v0 = vpop.f32.mrf.mxu0 }
 0x3d6   : > { %v1502_v2 = vadd.f32 %v3379_v34, %v1501_v0 }
 0x3d7   : > { %v2745_v3 = vpop.f32.mrf.mxu0 }
 0x3d8   : > { %v1507_v4 = vsel %vm1283_vm3, %v1502_v2, -inf }
 0x3d9   : > { %1508 = vmax.xlane.f32.xlu1 %v1507_v4  ;;  %v1504_v5 = vpop.f32.mrf.mxu0  ;;  %v2916_v4 = vld [vmem:[%s3627_s28 + $0x38] sm:$0xff]  }
 0x3db   : > { %v2746_v6 = vpop.f32.mrf.mxu0 }
 0x3dc   : > { %v2917_v6 = vld [vmem:[%s3627_s28 + $0x30] sm:$0xff]  }
 0x462   : > { %v1509_v7 = vpop.xlane.xlu1 %1508 }
 0x463   : > { %v1510_v8 = vsub.f32 %v1502_v2, %v1509_v7  ;;  %v2015_v7 = vld [vmem:[#allocation3 + $0xc] sm:$0xf] }
 0x465   : > { %v1511_v9 = vmul.f32 1.442695, %v1510_v8  ;;  %v2020_v8 = vsel %vm1346_vm4, %v2015_v7, 0 }
 0x467   : > { %2928 = vpow2.f32 %v1511_v9 }
 0x474   : > { %v2929_v10 = vpop.eup %2928 }
 0x475   : > { %v1513_v11 = vsel %vm1283_vm3, %v2929_v10, 0.0 }
 0x476   : > { %1514 = vadd.xlane.f32.xlu1 %v1513_v11 }
 0x4ff   : > { %v1515_v14 = vpop.xlane.xlu1 %1514 }
 0x500   : > { %2930 = vrcp.f32 %v1515_v14 }
 0x50d   : > { %v2931_v15 = vpop.eup %2930 }
 0x50e   : > { %v1517_v17 = vmul.f32 %v2931_v15, %v2929_v10  ;;  %v1955_v10 = vld [vmem:[#allocation2 + $0xc] sm:$0xf]  ;;  %v2554_v15 = vld [vmem:[%s3630_s4 + $0x3] ss:$0 sm:$0xff] }
 0x50f   : > { %v1960_v13 = vsel %vm1283_vm3, %v1955_v10, 0 }
 0x510   : > { %v1518_v20 = vpack.c.bf16 %v1517_v17, %v1517_v17 }
 0x512   : > { %2750 = vmatmul.mubr.msk.bf16.vlgmr.msra.gmra.mxu1 %vm1283_vm3, %v1518_v20 }
 0x513   : > { %2760 = vmatpush3.bf16.msra.mxu1 %v1620_v21  ;;  %2761 = vmatprep.mubr.msk.bf16.mxu1 %vm3025_vm0, %v3024_v1 }
 0x514   : > { %2773 = vmatprep.subr.bf16.mxu1 %v3024_v1 }
 0x51a   : > { %2762 = vmatmul.mubr.msk.bf16.vlgmr.msra.gmra.mxu1 %vm1283_vm3, %v1390_v23 }
 0x51b   : > { %2774 = vmatpush3.bf16.xpose.msra.mxu1 %v1735_v24  ;;  %2775 = vmatprep.mubr.msk.bf16.mxu1 %vm3025_vm0, %v3024_v1 }
 0x51c   : > { %2785 = vmatprep.subr.bf16.mxu1 %v3024_v1 }
 0x5d2   : > { %v1561_v25 = vpop.f32.mrf.mxu1 }
 0x5d3   : > { %v1567_v27 = vpack.c.bf16 %v1561_v25, %v1561_v25 }
 0x5d4   : > { %v2751_v28 = vpop.f32.mrf.mxu1 }
 0x5d5   : > { %2756 = vmatmul.mubr.msk.bf16.vlgmr.msra.gmra.mxu0 %vm1283_vm3, %v1567_v27 }
 0x5d6   : > { %2766 = vmatpush3.bf16.msra.mxu0 %v2914_v26  ;;  %v1564_v29 = vpop.f32.mrf.mxu1  ;;  %2769 = vmatprep.mubr.msk.bf16.mxu0 %vm3025_vm0, %v3024_v1 }
 0x5d7   : > { %2767 = vmatprep.subr.bf16.mxu0 %v3024_v1 }
 0x5d8   : > { %v2752_v31 = vpop.f32.mrf.mxu1 }
 0x5da   : > { %2768 = vmatpush3.bf16.msra.mxu0 %v2915_v30  ;;  %v3426_v32 = vpop.f32.mrf.mxu1 }
 0x5db   : > { %2779 = vmatprep.subr.bf16.mxu0 %v3024_v1 }
 0x5dc   : > { %v2763_v35 = vpop.f32.mrf.mxu1 }
 0x5dd   : > { %2770 = vmatmul.mubr.msk.bf16.vlgmr.msra.gmra.mxu0 %vm684_vm1, %v3292_v19 }
 0x5de   : > { %2780 = vmatpush3.bf16.msra.mxu0 %v1795_v36  ;;  %v1659_v37 = vpop.f32.mrf.mxu1  ;;  %2781 = vmatprep.mubr.msk.bf16.mxu0 %vm3025_vm0, %v3024_v1 }
 0x5df   : > { %2791 = vmatprep.subr.bf16.mxu0 %v3024_v1 }
 0x5e0   : > { %v2764_v38 = vpop.f32.mrf.mxu1 }
 0x695   : > { %v3435_v39 = vpop.f32.mrf.mxu0 }
 0x696   : > { %v1657_v25 = vadd.f32 %v3426_v32, %v3435_v39  ;;  %v2560_v39 = vld [vmem:[%s3593_s9 + $0xc] sm:$0xf] }
 0x697   : > { %v2757_v40 = vpop.f32.mrf.mxu0 }
 0x699   : > { %v1613_v41 = vpop.f32.mrf.mxu0 }
 0x69b   : > { %v2758_v42 = vpop.f32.mrf.mxu0 }
 0x69d   : > { %v1721_v44 = vpop.f32.mrf.mxu0 }
 0x69e   : > { %v1722_v45 = vadd.f32 %v2541_v43, %v1721_v44 }
 0x69f   : > { %v2771_v46 = vpop.f32.mrf.mxu0 }
 0x6a0   : > { %v1727_v47 = vmul.f32 0.35355338, %v1722_v45 }
 0x6a1   : > { %v1724_v48 = vpop.f32.mrf.mxu0 }
 0x6a2   : > { %v1728_v49 = vpack.c.bf16 %v1727_v47, %v1727_v47 }
 0x6a3   : > { %v2772_v50 = vpop.f32.mrf.mxu0 }
 0x6a4   : > { %2776 = vmatmul.mubr.msk.bf16.vlgmr.msra.gmra.mxu1 %vm1283_vm3, %v1728_v49 }
 0x6a5   : > { %2787 = vmatprep.mubr.msk.bf16.mxu1 %vm3025_vm0, %v3024_v1  ;;  %2786 = vmatpush3.bf16.msra.mxu1 %v1844_v63 }
 0x6a6   : > { %2799 = vmatprep.subr.bf16.mxu1 %v3024_v1 }
 0x764   : > { %v1771_v51 = vpop.f32.mrf.mxu1 }
 0x765   : > { %v1772_v52 = vadd.f32 %v3379_v34, %v1771_v51 }
 0x766   : > { %v2777_v53 = vpop.f32.mrf.mxu1 }
 0x767   : > { %v1777_v54 = vsel %vm1283_vm3, %v1772_v52, -inf }
 0x768   : > { %1778 = vmax.xlane.f32.xlu0 %v1777_v54  ;;  %v1774_v55 = vpop.f32.mrf.mxu1  ;;  %v2562_v54 = vld [vmem:[%s3594_s10] ss:$0 sm:$0xff] }
 0x76a   : > { %v2778_v56 = vpop.f32.mrf.mxu1 }
 0x7f1   : > { %v1779_v57 = vpop.xlane.xlu0 %1778 }
 0x7f2   : > { %v1780_v58 = vsub.f32 %v1772_v52, %v1779_v57 }
 0x7f4   : > { %v1781_v59 = vmul.f32 1.442695, %v1780_v58 }
 0x7f6   : > { %2932 = vpow2.f32 %v1781_v59 }
 0x803   : > { %v2933_v60 = vpop.eup %2932 }
 0x804   : > { %v1783_v61 = vsel %vm1283_vm3, %v2933_v60, 0.0 }
 0x805   : > { %1784 = vadd.xlane.f32.xlu1 %v1783_v61 }
 0x88e   : > { %v1785_v0 = vpop.xlane.xlu1 %1784 }
 0x88f   : > { %2934 = vrcp.f32 %v1785_v0 }
 0x89c   : > { %v2935_v2 = vpop.eup %2934 }
 0x89d   : > { %v1787_v3 = vmul.f32 %v2935_v2, %v2933_v60 }
 0x89f   : > { %v1788_v5 = vpack.c.bf16 %v1787_v3, %v1787_v3 }
 0x8a1   : > { %2782 = vmatmul.mubr.msk.bf16.vlgmr.msra.gmra.mxu0 %vm1283_vm3, %v1788_v5 }
 0x8a2   : > { %2792 = vmatpush3.bf16.msra.mxu0 %v2916_v4  ;;  %2795 = vmatprep.mubr.msk.bf16.mxu0 %vm3025_vm0, %v3024_v1  ;;  %v2918_v4 = vld [vmem:[%s3597_s13 + $0x8] sm:$0xff]  }
 0x8a3   : > { %2793 = vmatprep.subr.bf16.mxu0 %v3024_v1 }
 0x8a6   : > { %2794 = vmatpush3.bf16.msra.mxu0 %v2917_v6 }
 0x8a7   : > { %2805 = vmatprep.subr.bf16.mxu0 %v3024_v1 }
 0x8a9   : > { %2796 = vmatmul.mubr.msk.bf16.vlgmr.msra.gmra.mxu0 %vm684_vm1, %v3292_v19 }
 0x8aa   : > { %2806 = vmatpush3.bf16.msra.mxu0 %v2020_v8  ;;  %2807 = vmatprep.mubr.msk.bf16.mxu0 %vm3025_vm0, %v3024_v1 }
 0x8ab   : > { %2817 = vmatprep.subr.bf16.mxu0 %v3024_v1 }
 0x961   : > { %v1831_v9 = vpop.f32.mrf.mxu0 }
 0x962   : > { %v1837_v11 = vpack.c.bf16 %v1831_v9, %v1831_v9  ;;  %v2563_v9 = vld [vmem:[%s3595_s11] ss:$0 sm:$0xff] }
 0x963   : > { %v2783_v12 = vpop.f32.mrf.mxu0 }
 0x964   : > { %2788 = vmatmul.mubr.msk.bf16.vlgmr.msra.gmra.mxu1 %vm1283_vm3, %v1837_v11  ;;  %v2564_v11 = vld [vmem:[%s3596_s12] ss:$0 sm:$0xff] }
 0x965   : > { %2800 = vmatpush3.bf16.xpose.msra.mxu1 %v1960_v13  ;;  %v1834_v14 = vpop.f32.mrf.mxu0  ;;  %2801 = vmatprep.mubr.msk.bf16.mxu1 %vm3025_vm0, %v3024_v1 }
 0x966   : > { %2811 = vmatprep.subr.bf16.mxu1 %v3024_v1 }
 0x967   : > { %v2784_v19 = vpop.f32.mrf.mxu0 }
 0x968   : > { %v2920_v19 = vld [vmem:[%s3599_s15 + $0x18] sm:$0xff]  }
 0x969   : > { %v1946_v16 = vpop.f32.mrf.mxu0 }
 0x96a   : > { %v1947_v17 = vadd.f32 %v2554_v15, %v1946_v16  ;;  %v2921_v15 = vld [vmem:[%s3599_s15 + $0x10] sm:$0xff]   ;;  %v2922_v16 = vld [vmem:[%s3599_s15 + $0x8] sm:$0xff]  }
 0x96b   : > { %v2797_v20 = vpop.f32.mrf.mxu0 }
 0x96c   : > { %v1952_v21 = vmul.f32 0.35355338, %v1947_v17  ;;  %v2923_v17 = vld [vmem:[%s3599_s15] sm:$0xff]  }
 0x96d   : > { %v1949_v22 = vpop.f32.mrf.mxu0  ;;  %v2565_v20 = vld [vmem:[%s3598_s14] ss:$0 sm:$0xff] }
 0x96e   : > { %v1953_v23 = vpack.c.bf16 %v1952_v21, %v1952_v21 }
 0x96f   : > { %v2798_v24 = vpop.f32.mrf.mxu0 }
 0x970   : > { %2802 = vmatmul.mubr.msk.bf16.vlgmr.msra.gmra.mxu1 %vm1283_vm3, %v1953_v23 }
 0x971   : > { %2813 = vmatprep.mubr.msk.bf16.mxu1 %vm3025_vm0, %v3024_v1 }
 0xa24   : > { %v1880_v26 = vpop.f32.mrf.mxu1 }
 0xa25   : > { %v1886_v27 = vadd.f32 %v1880_v26, %v1657_v25 }
 0xa26   : > { %v2789_v28 = vpop.f32.mrf.mxu1 }
 0xa28   : > { %v1883_v29 = vpop.f32.mrf.mxu1 }
 0xa2a   : > { %v2790_v30 = vpop.f32.mrf.mxu1 }
 0xa30   : > { %v1996_v31 = vpop.f32.mrf.mxu1 }
 0xa31   : > { %v1997_v33 = vadd.f32 %v3379_v34, %v1996_v31  ;;  %v2069_v34 = vsel %vm1346_vm4, %v2560_v39, 0  ;;  %v2569_v31 = vld [vmem:[%s3600_s16] ss:$0 sm:$0xff] }
 0xa32   : > { %v2803_v35 = vpop.f32.mrf.mxu1  ;;  %2812 = vmatpush3.bf16.msra.mxu1 %v2069_v34 }
 0xa33   : > { %v2002_v36 = vsel %vm1283_vm3, %v1997_v33, -inf  ;;  %2825 = vmatprep.subr.bf16.mxu1 %v3024_v1 }
 0xa34   : > { %2003 = vmax.xlane.f32.xlu0 %v2002_v36  ;;  %v1999_v37 = vpop.f32.mrf.mxu1 }
 0xa36   : > { %v2804_v38 = vpop.f32.mrf.mxu1 }
 0xabd   : > { %v2004_v40 = vpop.xlane.xlu0 %2003 }
 0xabe   : > { %v2005_v41 = vsub.f32 %v1997_v33, %v2004_v40 }
 0xac0   : > { %v2006_v42 = vmul.f32 1.442695, %v2005_v41 }
 0xac2   : > { %2936 = vpow2.f32 %v2006_v42 }
 0xacf   : > { %v2937_v43 = vpop.eup %2936 }
 0xad0   : > { %v2008_v32 = vsel %vm1283_vm3, %v2937_v43, 0.0 }
 0xad1   : > { %2009 = vadd.xlane.f32.xlu1 %v2008_v32 }
 0xb5a   : > { %v2010_v44 = vpop.xlane.xlu1 %2009 }
 0xb5b   : > { %2938 = vrcp.f32 %v2010_v44 }
 0xb68   : > { %v2939_v45 = vpop.eup %2938 }
 0xb69   : > { %v2012_v46 = vmul.f32 %v2939_v45, %v2937_v43 }
 0xb6b   : > { %v2013_v47 = vpack.c.bf16 %v2012_v46, %v2012_v46 }
 0xb6d   : > { %2808 = vmatmul.mubr.msk.bf16.vlgmr.msra.gmra.mxu0 %vm1283_vm3, %v2013_v47 }
 0xb6e   : > { %2821 = vmatprep.mubr.msk.bf16.mxu0 %vm3025_vm0, %v3024_v1  ;;  %2818 = vmatpush3.bf16.msra.mxu0 %v2918_v4 }
 0xb6f   : > { %2819 = vmatprep.subr.bf16.mxu0 %v3024_v1 }
 0xc2d   : > { %v2056_v48 = vpop.f32.mrf.mxu0 }
 0xc2e   : > { %v2062_v49 = vpack.c.bf16 %v2056_v48, %v2056_v48  ;;  %v2575_v48 = vld [vmem:[%s3601_s17] ss:$0 sm:$0xff] }
 0xc2f   : > { %v2809_v50 = vpop.f32.mrf.mxu0 }
 0xc30   : > { %2814 = vmatmul.mubr.msk.bf16.vlgmr.msra.gmra.mxu1 %vm1283_vm3, %v2062_v49  ;;  %v2576_v50 = vld [vmem:[%s3602_s18] ss:$0 sm:$0xff] }
 0xc31   : > { %v2059_v51 = vpop.f32.mrf.mxu0  ;;  %2833 = vmatprep.mubr.msk.bf16.mxu1 %vm3025_vm0, %v3024_v1  ;;  %2826 = vmatpush3.bf16.msra.mxu1 %v2920_v19 }
 0xc32   : > { %2827 = vmatprep.subr.bf16.mxu1 %v3024_v1 }
 0xc33   : > { %v2810_v52 = vpop.f32.mrf.mxu0 }
 0xc35   : > { %2828 = vmatpush3.bf16.msra.mxu1 %v2921_v15 }
 0xc36   : > { %2829 = vmatprep.subr.bf16.mxu1 %v3024_v1 }
 0xc39   : > { %2830 = vmatpush3.bf16.msra.mxu1 %v2922_v16 }
 0xc3a   : > { %2831 = vmatprep.subr.bf16.mxu1 %v3024_v1 }
 0xc3d   : > { %2832 = vmatpush3.bf16.msra.mxu1 %v2923_v17 }
 0xcf0   : > { %v2105_v53 = vpop.f32.mrf.mxu1 }
 0xcf1   : > { %v2111_v55 = vadd.f32 %v2105_v53, %v1886_v27 }
 0xcf2   : > { %v2815_v56 = vpop.f32.mrf.mxu1 }
 0xcf3   : > { %v2119_v57 = vadd.f32 %v2562_v54, %v2111_v55 }
 0xcf4   : > { %v2108_v58 = vpop.f32.mrf.mxu1 }
 0xcf5   : > { %v2120_v59 = vadd.f32 %v2119_v57, %v3287_v18  ;;  %v2919_v18 = vld [vmem:[%s3597_s13] sm:$0xff]  }
 0xcf6   : > { %v2816_v60 = vpop.f32.mrf.mxu1  ;;  %2820 = vmatpush3.bf16.msra.mxu0 %v2919_v18 }
 0xcf7   : > { %v2123_v61 = vsel %vm684_vm1, %v2120_v59, 0.0 }
 0xcf8   : > { %2124 = vadd.xlane.f32.xlu0 %v2123_v61 }
 0xd81   : > { %v2125_v62 = vpop.xlane.xlu0 %2124 }
 0xd82   : > { %v2127_v63 = vmul.f32 0.03125, %v2125_v62 }
 0xd84   : > { %v2128_v0 = vsub.f32 %v2120_v59, %v2127_v63 }
 0xd86   : > { %v2129_v2 = vmul.f32 %v2128_v0, %v2128_v0 }
 0xd88   : > { %v2130_v3 = vsel %vm684_vm1, %v2129_v2, 0.0 }
 0xd89   : > { %2131 = vadd.xlane.f32.xlu1 %v2130_v3 }
 0xe12   : > { %v2132_v5 = vpop.xlane.xlu1 %2131 }
 0xe13   : > { %v2133_v6 = vmul.f32 0.03125, %v2132_v5 }
 0xe15   : > { %v2134_v7 = vadd.f32 1e-12, %v2133_v6 }
 0xe17   : > { %2940 = vrsqrt.f32 %v2134_v7 }
 0xe24   : > { %v2941_v8 = vpop.eup %2940 }
 0xe25   : > { %v2136_v10 = vmul.f32 %v2941_v8, %v2128_v0 }
 0xe27   : > { %v2143_v12 = vmul.f32 %v2563_v9, %v2136_v10 }
 0xe29   : > { %v2150_v13 = vadd.f32 %v2564_v11, %v2143_v12 }
 0xe2b   : > { %v2151_v14 = vpack.c.bf16 %v2150_v13, %v2150_v13 }
 0xe2d   : > { %2822 = vmatmul.mubr.msk.bf16.vlgmr.msra.gmra.mxu0 %vm684_vm1, %v2151_v14 }
 0xeed   : > { %v2212_v21 = vpop.f32.mrf.mxu0 }
 0xeee   : > { %v2213_v22 = vadd.f32 %v2565_v20, %v2212_v21 }
 0xeef   : > { %v2823_v23 = vpop.f32.mrf.mxu0 }
 0xef0   : > { %v2219_v24 = vmul.f32 0.70710677, %v2213_v22  ;;  %v2218_v28 = vmul.f32 0.5, %v2213_v22 }
 0xef1   : > { %v2215_v25 = vpop.f32.mrf.mxu0 }
 0xef2   : > { %2942 = verf.f32 %v2219_v24 }
 0xef3   : > { %v2824_v26 = vpop.f32.mrf.mxu0 }
 0xeff   : > { %v2943_v27 = vpop.eup %2942 }
 0xf00   : > { %v2221_v29 = vadd.f32 1.0, %v2943_v27 }
 0xf02   : > { %v2222_v1 = vmul.f32 %v2221_v29, %v2218_v28 }
 0xf04   : > { %v2223_v30 = vpack.c.bf16 %v2222_v1, %v2222_v1 }
 0xf06   : > { %2834 = vmatmul.mubr.msk.bf16.vlgmr.msra.gmra.mxu1 %vm2263_vm5, %v2223_v30 }
 0xfc6   : > { %v2301_v33 = vpop.f32.mrf.mxu1 }
 0xfc7   : > { %v2302_v35 = vadd.f32 %v2569_v31, %v2301_v33 }
 0xfc8   : > { %v2835_v36 = vpop.f32.mrf.mxu1 }
 0xfc9   : > { %v2307_v37 = vadd.f32 %v2302_v35, %v2150_v13 }
 0xfca   : > { %v2304_v38 = vpop.f32.mrf.mxu1 }
 0xfcb   : > { %v2310_v40 = vsel %vm684_vm1, %v2307_v37, 0.0 }
 0xfcc   : > { %2311 = vadd.xlane.f32.xlu0 %v2310_v40  ;;  %v2836_v41 = vpop.f32.mrf.mxu1 }
0x1055   : > { %v2312_v42 = vpop.xlane.xlu0 %2311 }
0x1056   : > { %v2313_v43 = vmul.f32 0.03125, %v2312_v42 }
0x1058   : > { %v2314_v32 = vsub.f32 %v2307_v37, %v2313_v43 }
0x105a   : > { %v2315_v39 = vmul.f32 %v2314_v32, %v2314_v32 }
0x105c   : > { %v2316_v34 = vsel %vm684_vm1, %v2315_v39, 0.0 }
0x105d   : > { %2317 = vadd.xlane.f32.xlu1 %v2316_v34 }
0x10e6   : > { %v2318_v44 = vpop.xlane.xlu1 %2317 }
0x10e7   : > { %v2319_v45 = vmul.f32 0.03125, %v2318_v44 }
0x10e9   : > { %v2320_v46 = vadd.f32 1e-12, %v2319_v45 }
0x10eb   : > { %2944 = vrsqrt.f32 %v2320_v46 }
0x10f8   : > { %v2945_v47 = vpop.eup %2944 }
0x10f9   : > { %v2322_v49 = vmul.f32 %v2945_v47, %v2314_v32 }
0x10fb   : > { %v2329_v51 = vmul.f32 %v2575_v48, %v2322_v49 }
0x10fd   : > { %v2336_v52 = vadd.f32 %v2576_v50, %v2329_v51 }
0x10ff   : > { %2337 = vst.msk [vmem:[%s639_s27] sm:$0xff] %vm684_vm1, %v2336_v52 }
0x1100   : > { %2959 = shalt.err (!%p2956_p5)
}
0x1101   : > { %s2960_s4 = scalar_lea.hbm %s2351_s6, 128  ;;  %s2964_s20 = scalar_lea.hbm %s3603_s19, 256 }
0x1102   : > { %p2961_p6 = scmp.ne.s32.totalorder %s2351_s6, %s2960_s4  ;;  %p2965_p10 = scmp.lt.s32.totalorder %s2351_s6, %s3603_s19 }
0x1103   : > { %p2966_p11 = scmp.lt.s32.totalorder %s2964_s20, %s2960_s4 }
0x1104   : > { %p2962_p7 = pnand %p2961_p6, %p3167_p4 }
0x1105   : > { %p2967_p12 = por %p2966_p11, %p2965_p10 }
0x1106   : > { %p2963_p9 = pneg %p2962_p7 }
0x1108   : > { %p2968_p13 = pnand %p2967_p12, %p2963_p9 }
0x110a   : > { %2971 = shalt.err (!%p2968_p13)
}
0x110b   : > { %2837 = dma.vmem_to_hbm [thread:$0]  (%p3167_p4), %s2354_s26, 128, %s2351_s6, %s2339_s7  }
0x110c PF: > { %p2843_p0 = scmp.ge.s32.totalorder %s3022_s22, 2  ;;  %s2365_s29 = sand.u32 1, %s3002_s0  }
0x110d   : > { %s2366_s1 = scalar_lea.sflag [#allocation5], %s2365_s29 }
0x110e   : > { %p2840_p1 = pnand %p2843_p0, %p3174_p8 }
0x1110   : > { %p2841_p2 = pneg %p2840_p1 }
0x1112   : > { %2997 = dma.done.wait (%p2841_p2), %s2366_s1, 128  }
0x1113   : > { %2999 = vsyncadd (%p2841_p2), %s2366_s1, 4294967168  ;;  %s32_s22 = sadd.s32 1, %s3022_s22   ;;  %s3633_s24 = sld [smem:[#allocation7_spill]] }
0x1114   : > { %p29_p3 = scmp.ge.s32.totalorder %s32_s22, 4   ;;  %s3634_s20 = sld [smem:[#allocation11_spill]] }
0x1115   : > { %s3635_s21 = sld [smem:[#allocation8_spill]]  ;;  %s3637_s0 = smov %s3006_s30 }
0x1116   : > { %s3636_s1 = sld [smem:[#allocation9_spill]]  ;;  %31 = sbr.rel (!%p29_p3) target bundleno = 13 (0xd), region = 174 }
0x1119   : > { %s3638_s30 = smov %s3633_s24 }
0x111b   :  { %2371 = vsyncpa [#allocation5], 1 }
0x111c   :  { %2373 = vsyncpa [#allocation5 + $0x1], 1 }

</bundles_post_ra>
